<compile_context>
chip_gen: v5e
topology: v5e:2x2
jax: 0.10.0
libtpu: 0.0.40
codegen_flags: <defaults>
</compile_context>

<pallas_src>
import jax
import jax.numpy as jnp
from jax import lax
from jax.experimental import pallas as pl
from jax.experimental.pallas import tpu as pltpu


# ----------------------------------------------------------------------------
# Pallas kernel (one grid block = TN whole samples)
#   cxt_ref : (TN, 8)      = [cx(5) | time_emb(2) | 1.0]        (bias lane = 7)
#   xf_ref  : (TN, L, 16)  = ex channels-last, channel 15 == 1.0 (bias lane)
#   we_ref  : (32, 384)    external-net slab, 128-lane aligned column groups
#   wd_ref  : (72, 128)    dense-head slab, 8-sublane aligned row groups
#   out_ref : (TN, 32)     = [feature(20) | ratio(3) | domain_log(2) | pad(7)]
# ----------------------------------------------------------------------------
def st_dann_kernel(cxt_ref, xf_ref, we_ref, wd_ref, out_ref):
    f32 = jnp.float32
    TN = cxt_ref.shape[0]
    L = xf_ref.shape[1]
    NL = TN * L

    def dot(a, b):
        return jnp.dot(a, b, preferred_element_type=f32)

    def bmm(a, b):                      # per-sample (batched) matmul
        return jnp.einsum('blm,bmc->blc', a, b, preferred_element_type=f32)

    cxt = cxt_ref[...]                              # (TN, 8)
    xf2 = xf_ref[...].reshape(NL, 16)               # (NL, 16), trivial tile merge

    # ---- external_feature_net -------------------------------------------------
    # Conv1d(k=1) + BN1 folded; output lane 16 carries the ones lane for biases.
    h1x = jnp.maximum(dot(xf2, we_ref[0:16, 0:32]), 0.0)          # (NL, 32)

    # fused q | k | lambda*v projection (biases ride the ones lane)
    qkv = dot(h1x, we_ref[0:32, 128:192])                         # (NL, 64)
    qkv3 = qkv.reshape(TN, L, 64)
    q3 = qkv3[:, :, 0:16]
    k3 = qkv3[:, :, 16:32]
    v3 = qkv3[:, :, 32:64]                                        # lanes 48:64 zero

    # per-sample attention (L x L logits per sample; no cross-sample terms)
    e = jnp.einsum('blc,bmc->blm', q3, k3, preferred_element_type=f32)
    e = e - jnp.max(e, axis=-1, keepdims=True)
    p = jnp.exp(e)
    att = p / jnp.sum(p, axis=-1, keepdims=True)
    h2x3 = bmm(att, v3) + h1x.reshape(TN, L, 32)                  # lane 16 stays 1.0

    # Conv1d(16->16, k=3, pad=1) + BN2 folded: three taps in one matmul, then
    # per-sample +-1 shifts along L via tiny (L, L) shift matmuls (portable;
    # cheap because L == 8; boundary rows zero automatically).
    taps = dot(h2x3.reshape(NL, 32), we_ref[0:32, 256:304])       # (NL, 48)
    t3 = taps.reshape(TN, L, 48)
    a3 = t3[:, :, 0:16]                 # tap applied to x[l-1]
    b3 = t3[:, :, 16:32]                # centre tap (bias + BN shift folded here)
    c3 = t3[:, :, 32:48]                # tap applied to x[l+1]
    ri = lax.broadcasted_iota(jnp.int32, (TN, L, L), 1)
    ci = lax.broadcasted_iota(jnp.int32, (TN, L, L), 2)
    sdown = (ci == ri - 1).astype(f32)  # picks row l-1 (zero at l == 0)
    sup = (ci == ri + 1).astype(f32)    # picks row l+1 (zero at l == L-1)
    y3 = jnp.maximum(bmm(sdown, a3) + b3 + bmm(sup, c3), 0.0)     # (TN, L, 16)

    # AdaptiveAvgPool2d((16, 1)) == mean over L (sublane reduction)
    ext = jnp.sum(y3, axis=1) * (1.0 / L)                         # (TN, 16)

    # ---- dense heads (all biases ride ones lanes; no bias rows / adds) --------
    f0 = dot(cxt, wd_ref[0:8, :])       # lanes 0:5 s1 | 7 ones | 8:11 time part
    s1x = jnp.maximum(f0, 0.0)
    s2x = jnp.maximum(dot(s1x[:, 0:8], wd_ref[8:16, :]), 0.0)     # 0:4 s2 | 7 ones
    hpd1 = jnp.maximum(dot(s2x[:, 0:8], wd_ref[16:24, :])
                       + dot(ext, wd_ref[24:40, :]), 0.0)         # 0:10 hp|16:26 d1|31 ones
    pd = dot(hpd1[:, 0:32], wd_ref[40:72, :])                     # 0:3 ratio_pre | 8:10 dl

    ratio = jnp.maximum(pd[:, 0:3] + f0[:, 8:11], 0.0)            # (TN, 3)
    dl = pd[:, 8:10]
    mx = jnp.max(dl, axis=1, keepdims=True)
    dlog = dl - (mx + jnp.log(jnp.sum(jnp.exp(dl - mx), axis=1, keepdims=True)))

    # single coalesced writeback
    out_ref[...] = jnp.concatenate(
        [s2x[:, 0:4], ext, ratio, dlog, jnp.zeros((TN, 7), f32)], axis=1)


# ----------------------------------------------------------------------------
# Parameter init (deterministic, shapes from St_Dann.__init__)
# ----------------------------------------------------------------------------
def init_params(key, num_neigh):
    ks = jax.random.split(key, 20)

    def lin(k, o, i, s=0.3):
        kw, kb = jax.random.split(k)
        return (jax.random.normal(kw, (o, i), jnp.float32) * s,
                jax.random.normal(kb, (o,), jnp.float32) * s)

    def bn(k, c, eps=1e-5):
        kg, kb, km, kv = jax.random.split(k, 4)
        gamma = 1.0 + 0.1 * jax.random.normal(kg, (c,), jnp.float32)
        beta = 0.1 * jax.random.normal(kb, (c,), jnp.float32)
        mean = 0.1 * jax.random.normal(km, (c,), jnp.float32)
        var = 1.0 + 0.5 * jax.random.uniform(kv, (c,), jnp.float32)
        scale = gamma / jnp.sqrt(var + eps)
        shift = beta - mean * scale
        return scale, shift

    p = {}
    p['ws1'], p['bs1'] = lin(ks[0], 5, 5)
    p['ws2'], p['bs2'] = lin(ks[1], 4, 5)
    p['wc1'], p['bc1'] = lin(ks[2], 16, num_neigh)         # Conv1d k=1 weight (16, C_in)
    p['sc1'], p['sh1'] = bn(ks[3], 16)
    p['wq'], p['bq'] = lin(ks[4], 16, 16)
    p['wk'], p['bk'] = lin(ks[5], 16, 16)
    p['wv'], p['bv'] = lin(ks[6], 16, 16)
    # torch initializes para_lambda to 0; use a nonzero deterministic value so
    # the SAM attention path actually contributes.
    p['lam'] = jnp.array([0.7], jnp.float32)
    kw3, kb3 = jax.random.split(ks[7])
    p['w3'] = jax.random.normal(kw3, (16, 16, 3), jnp.float32) * 0.2   # Conv1d k=3 weight
    p['bc3'] = jax.random.normal(kb3, (16,), jnp.float32) * 0.2
    p['sc2'], p['sh2'] = bn(ks[8], 16)
    p['wp1'], p['bp1'] = lin(ks[9], 10, 20)
    p['scp'], p['shp'] = bn(ks[10], 10)
    p['wp2'], p['bp2'] = lin(ks[11], 6, 10)
    p['emb'] = jax.random.normal(ks[12], (26, 2), jnp.float32) * 0.5   # Embedding(26, 2)
    p['wr'], p['br'] = lin(ks[13], 3, 8)
    p['wd1'], p['bd1'] = lin(ks[14], 10, 20)
    p['wd2'], p['bd2'] = lin(ks[15], 2, 10)
    return p


# ----------------------------------------------------------------------------
# One-time packing: fold BN(eval) + para_lambda + all biases (via ones lanes)
# into two tile-aligned weight slabs.  Done at param-prep time, NOT per call.
# ----------------------------------------------------------------------------
def pack_params(p):
    f32 = jnp.float32
    num_neigh = p['wc1'].shape[1]
    assert num_neigh <= 15, "channel 15 is reserved as the bias (ones) lane"

    # ---- external slab (32, 384); column groups at 128-lane boundaries -------
    w1_eff = (p['wc1'] * p['sc1'][:, None]).T                    # (num_neigh, 16)
    b1_eff = p['bc1'] * p['sc1'] + p['sh1']
    lam = p['lam'][0]
    w3_eff = p['w3'] * p['sc2'][:, None, None]
    b3_eff = p['bc3'] * p['sc2'] + p['sh2']

    we = jnp.zeros((32, 384), f32)
    # block A (cols 0:32): conv1(k=1)+BN1; input = xf channels (ones at ch 15)
    we = we.at[0:num_neigh, 0:16].set(w1_eff)
    we = we.at[15, 0:16].set(b1_eff)
    we = we.at[15, 16].set(1.0)                                  # ones-lane propagation
    # block B (cols 128:192): fused [q | k | lambda*v]; input = h1x (ones at 16)
    we = we.at[0:16, 128:144].set(p['wq'].T)
    we = we.at[0:16, 144:160].set(p['wk'].T)
    we = we.at[0:16, 160:176].set(lam * p['wv'].T)
    we = we.at[16, 128:144].set(p['bq'])
    we = we.at[16, 144:160].set(p['bk'])
    we = we.at[16, 160:176].set(lam * p['bv'])
    # block C (cols 256:304): conv k=3 taps + BN2; bias folded into centre tap
    we = we.at[0:16, 256:272].set(w3_eff[:, :, 0].T)
    we = we.at[0:16, 272:288].set(w3_eff[:, :, 1].T)
    we = we.at[0:16, 288:304].set(w3_eff[:, :, 2].T)
    we = we.at[16, 272:288].set(b3_eff)

    # ---- dense slab (72, 128); row groups at 8-sublane boundaries -------------
    wp1_eff = p['wp1'].T * p['scp'][None, :]                     # (20, 10), BN folded
    bp1_eff = p['bp1'] * p['scp'] + p['shp']
    wd1T = p['wd1'].T                                            # (20, 10)
    wr6T = p['wr'][:, 0:6].T                                     # (6, 3)
    wrtT = p['wr'][:, 6:8].T                                     # (2, 3)
    m_ratio = p['wp2'].T @ wr6T                                  # fold p_fc2 o predict_dense
    b_ratio = p['bp2'] @ wr6T + p['br']

    wd = jnp.zeros((72, 128), f32)
    # rows 0:8  -- W0, input = cxt [cx(5) | temb(2) | 1]; out: s1@0:5, time@8:11
    wd = wd.at[0:5, 0:5].set(p['ws1'].T)
    wd = wd.at[5:7, 8:11].set(wrtT)
    wd = wd.at[7, 0:5].set(p['bs1'])
    wd = wd.at[7, 7].set(1.0)
    # rows 8:16 -- W1, input = s1x lanes 0:8; out: s2@0:4
    wd = wd.at[8:13, 0:4].set(p['ws2'].T)
    wd = wd.at[15, 0:4].set(p['bs2'])
    wd = wd.at[15, 7].set(1.0)
    # rows 16:24 -- station part of fused [predict_fc1 | domain_fc1]
    wd = wd.at[16:20, 0:10].set(wp1_eff[0:4])
    wd = wd.at[16:20, 16:26].set(wd1T[0:4])
    wd = wd.at[23, 0:10].set(bp1_eff)
    wd = wd.at[23, 16:26].set(p['bd1'])
    wd = wd.at[23, 31].set(1.0)
    # rows 24:40 -- external part of fused [predict_fc1 | domain_fc1]
    wd = wd.at[24:40, 0:10].set(wp1_eff[4:20])
    wd = wd.at[24:40, 16:26].set(wd1T[4:20])
    # rows 40:72 -- fused [predict_fc2 o predict_dense | domain_fc2]
    wd = wd.at[40:50, 0:3].set(m_ratio)
    wd = wd.at[56:66, 8:10].set(p['wd2'].T)
    wd = wd.at[71, 0:3].set(b_ratio)
    wd = wd.at[71, 8:10].set(p['bd2'])

    return {'we': we, 'wd': wd, 'emb': p['emb'].astype(f32)}


# ----------------------------------------------------------------------------
# Wrapper: embedding gather + lane-dense packing + whole-sample batched grid.
# ----------------------------------------------------------------------------
def st_dann_forward(packed, cx, ex, t, beta):
    # TODO(synk): ReverseLayerF only negates gradients in backward; forward is identity.
    del beta
    f32 = jnp.float32
    N, num_neigh, L = ex.shape
    assert num_neigh <= 15, "channel 15 is reserved as the bias (ones) lane"
    assert L % 8 == 0, "per-sample length must be sublane-aligned"

    temb = packed['emb'][t.reshape(-1)].astype(f32)                      # (N, 2)
    cxt = jnp.concatenate([cx.astype(f32), temb, jnp.ones((N, 1), f32)], axis=1)

    xf = jnp.transpose(ex.astype(f32), (0, 2, 1))                        # (N, L, C)
    xf = jnp.pad(xf, ((0, 0), (0, 0), (0, 16 - num_neigh)))              # (N, L, 16)
    xf = xf.at[:, :, 15].set(1.0)                                        # bias lane

    # whole-sample blocks; >=2 blocks for large batches so the "parallel" grid
    # axis can shard across v7x's two TensorCores.
    TN = min(32, ((N + 7) // 8) * 8)
    n_pad = -(-N // TN) * TN
    if n_pad != N:
        cxt = jnp.pad(cxt, ((0, n_pad - N), (0, 0)))
        xf = jnp.pad(xf, ((0, n_pad - N), (0, 0), (0, 0)))

    we, wd = packed['we'], packed['wd']
    nl = n_pad * L
    flops = (2 * nl * 32 * (32 + 64 + 48) + 8 * n_pad * L * L * 32
             + 2 * n_pad * 128 * (8 + 8 + 24 + 32))
    cost = pl.CostEstimate(
        flops=flops, transcendentals=n_pad * L * L + 3 * n_pad,
        bytes_accessed=4 * (cxt.size + xf.size + we.size + wd.size + n_pad * 32))

    out = pl.pallas_call(
        st_dann_kernel,
        out_shape=jax.ShapeDtypeStruct((n_pad, 32), f32),
        grid=(n_pad // TN,),
        in_specs=[
            pl.BlockSpec((TN, 8), lambda i: (i, 0)),
            pl.BlockSpec((TN, L, 16), lambda i: (i, 0, 0)),
            pl.BlockSpec((32, 384), lambda i: (0, 0)),
            pl.BlockSpec((72, 128), lambda i: (0, 0)),
        ],
        out_specs=pl.BlockSpec((TN, 32), lambda i: (i, 0)),
        compiler_params=pltpu.CompilerParams(dimension_semantics=("parallel",)),
        cost_estimate=cost,
    )(cxt, xf, we, wd)

    out = out[:N]
    feature = out[:, 0:20]
    ratio = out[:, 20:23]
    domain = out[:, 23:25]
    return ratio, domain, feature


# ----------------------------------------------------------------------------
# Pure-JAX reference (same eval-mode semantics) for correctness check
# ----------------------------------------------------------------------------
def st_dann_reference(p, cx, ex, t):
    s = jax.nn.relu(cx @ p['ws1'].T + p['bs1'])
    s = jax.nn.relu(s @ p['ws2'].T + p['bs2'])
    h = jnp.einsum('oc,ncl->nol', p['wc1'], ex) + p['bc1'][None, :, None]
    h = jax.nn.relu(h * p['sc1'][None, :, None] + p['sh1'][None, :, None])
    q = jnp.einsum('oc,ncl->nol', p['wq'], h) + p['bq'][None, :, None]
    k = jnp.einsum('oc,ncl->nol', p['wk'], h) + p['bk'][None, :, None]
    v = jnp.einsum('oc,ncl->nol', p['wv'], h) + p['bv'][None, :, None]
    att = jax.nn.softmax(jnp.einsum('ncl,ncm->nlm', q, k), axis=-1)
    sam = jnp.einsum('ncs,nls->ncl', v, att)
    h = p['lam'][0] * sam + h
    L = h.shape[-1]
    zcol = jnp.zeros(h.shape[:-1] + (1,), h.dtype)
    h_m1 = jnp.concatenate([zcol, h[..., :L - 1]], axis=-1)
    h_p1 = jnp.concatenate([h[..., 1:], zcol], axis=-1)
    y = (jnp.einsum('oc,ncl->nol', p['w3'][:, :, 0], h_m1)
         + jnp.einsum('oc,ncl->nol', p['w3'][:, :, 1], h)
         + jnp.einsum('oc,ncl->nol', p['w3'][:, :, 2], h_p1)
         + p['bc3'][None, :, None])
    y = jax.nn.relu(y * p['sc2'][None, :, None] + p['sh2'][None, :, None])
    ext = jnp.mean(y, axis=-1)
    feature = jnp.concatenate([s, ext], axis=1)
    hp = jax.nn.relu((feature @ p['wp1'].T + p['bp1']) * p['scp'] + p['shp'])
    pred = hp @ p['wp2'].T + p['bp2']
    temb = p['emb'][t.reshape(-1)]
    ratio = jax.nn.relu(jnp.concatenate([pred, temb], axis=1) @ p['wr'].T + p['br'])
    d = jax.nn.relu(feature @ p['wd1'].T + p['bd1'])
    domain = jax.nn.log_softmax(d @ p['wd2'].T + p['bd2'], axis=1)
    return ratio, domain, feature


if __name__ == "__main__":
    key = jax.random.PRNGKey(0)
    k_par, k_cx, k_ex, k_t, k_cx2, k_ex2, k_t2, _ = jax.random.split(key, 8)

    N, NUM_NEIGH, L = 4, 4, 8
    params = init_params(k_par, NUM_NEIGH)
    packed = pack_params(params)          # one-time packing / BN+lambda+bias folding

    cx = jax.random.normal(k_cx, (N, 5), jnp.float32)
    ex = jax.random.normal(k_ex, (N, NUM_NEIGH, L), jnp.float32)
    t = jax.random.randint(k_t, (N, 1), 0, 26, jnp.int32)
    beta = 0.5

    ratio, domain, feature = st_dann_forward(packed, cx, ex, t, beta)
    jax.block_until_ready((ratio, domain, feature))
    assert ratio.shape == (N, 3) and domain.shape == (N, 2) and feature.shape == (N, 20)

    r_ref, d_ref, f_ref = st_dann_reference(params, cx, ex, t)
    assert jnp.allclose(ratio, r_ref, atol=1e-3, rtol=1e-3)
    assert jnp.allclose(domain, d_ref, atol=1e-3, rtol=1e-3)
    assert jnp.allclose(feature, f_ref, atol=1e-3, rtol=1e-3)

    # second config: exercises the multi-block "parallel" grid + batch padding
    N2 = 40
    cx2 = jax.random.normal(k_cx2, (N2, 5), jnp.float32)
    ex2 = jax.random.normal(k_ex2, (N2, NUM_NEIGH, L), jnp.float32)
    t2 = jax.random.randint(k_t2, (N2, 1), 0, 26, jnp.int32)
    r2, d2, f2 = st_dann_forward(packed, cx2, ex2, t2, beta)
    jax.block_until_ready((r2, d2, f2))
    r2r, d2r, f2r = st_dann_reference(params, cx2, ex2, t2)
    assert jnp.allclose(r2, r2r, atol=1e-3, rtol=1e-3)
    assert jnp.allclose(d2, d2r, atol=1e-3, rtol=1e-3)
    assert jnp.allclose(f2, f2r, atol=1e-3, rtol=1e-3)

    print("KERNEL_OK")
</pallas_src>

<mosaic_0001>
module attributes {stable_mosaic.version = 11 : i64} {
  func.func @st_dann_kernel(%arg0: i32, %arg1: memref<8x8xf32, #tpu.memory_space<vmem>>, %arg2: memref<8x8x16xf32, #tpu.memory_space<vmem>>, %arg3: memref<32x384xf32, #tpu.memory_space<vmem>>, %arg4: memref<72x128xf32, #tpu.memory_space<vmem>>, %arg5: memref<8x32xf32, #tpu.memory_space<vmem>>) attributes {dimension_semantics = [#tpu.dimension_semantics<parallel>], iteration_bounds = array<i64: 1>, scalar_prefetch = 0 : i64, scratch_operands = 0 : i64, tpu.core_type = #tpu.core_type<tc>, window_params = [{transform_indices = @transform_0, window_bounds = array<i64: 8, 8>}, {transform_indices = @transform_1, window_bounds = array<i64: 8, 8, 16>}, {pipeline_mode = #tpu.pipeline_mode<synchronous>, transform_indices = @transform_2, window_bounds = array<i64: 32, 384>}, {pipeline_mode = #tpu.pipeline_mode<synchronous>, transform_indices = @transform_3, window_bounds = array<i64: 72, 128>}, {transform_indices = @transform_4, window_bounds = array<i64: 8, 32>}]} {
    %c0 = arith.constant 0 : index
    %c0_0 = arith.constant 0 : index
    %0 = vector.load %arg1[%c0, %c0_0] : memref<8x8xf32, #tpu.memory_space<vmem>>, vector<8x8xf32>
    %c0_1 = arith.constant 0 : index
    %c0_2 = arith.constant 0 : index
    %c0_3 = arith.constant 0 : index
    %1 = vector.load %arg2[%c0_1, %c0_2, %c0_3] : memref<8x8x16xf32, #tpu.memory_space<vmem>>, vector<8x8x16xf32>
    %2 = vector.shape_cast %1 : vector<8x8x16xf32> to vector<64x16xf32>
    %c0_4 = arith.constant 0 : index
    %c0_5 = arith.constant 0 : index
    %3 = vector.load %arg3[%c0_4, %c0_5] : memref<32x384xf32, #tpu.memory_space<vmem>>, vector<16x32xf32>
    %cst = arith.constant dense<0.000000e+00> : vector<64x32xf32>
    %4 = tpu.matmul %2, %3, %cst {dimension_numbers = #tpu.dot_dimension_numbers<[1], [0], [0], [1], [0, 0, 1, 1], [], []>} : vector<64x16xf32>, vector<16x32xf32>, vector<64x32xf32> -> vector<64x32xf32>
    %cst_6 = arith.constant 0.000000e+00 : f32
    %5 = vector.broadcast %cst_6 : f32 to vector<64x32xf32>
    %6 = arith.maximumf %4, %5 : vector<64x32xf32>
    %c0_7 = arith.constant 0 : index
    %c128 = arith.constant 128 : index
    %7 = vector.load %arg3[%c0_7, %c128] : memref<32x384xf32, #tpu.memory_space<vmem>>, vector<32x64xf32>
    %cst_8 = arith.constant dense<0.000000e+00> : vector<64x64xf32>
    %8 = tpu.matmul %6, %7, %cst_8 {dimension_numbers = #tpu.dot_dimension_numbers<[1], [0], [0], [1], [0, 0, 1, 1], [], []>} : vector<64x32xf32>, vector<32x64xf32>, vector<64x64xf32> -> vector<64x64xf32>
    %9 = vector.shape_cast %8 : vector<64x64xf32> to vector<8x8x64xf32>
    %10 = vector.extract_strided_slice %9 {offsets = [0, 0, 0], sizes = [8, 8, 16], strides = [1, 1, 1]} : vector<8x8x64xf32> to vector<8x8x16xf32>
    %11 = vector.extract_strided_slice %9 {offsets = [0, 0, 16], sizes = [8, 8, 16], strides = [1, 1, 1]} : vector<8x8x64xf32> to vector<8x8x16xf32>
    %12 = vector.extract_strided_slice %9 {offsets = [0, 0, 32], sizes = [8, 8, 32], strides = [1, 1, 1]} : vector<8x8x64xf32> to vector<8x8x32xf32>
    "tpu.trace_start"() <{level = 10 : i32, message = "blc,bmc->blm"}> : () -> ()
    %cst_9 = arith.constant dense<0.000000e+00> : vector<8x8x8xf32>
    %13 = tpu.matmul %10, %11, %cst_9 {dimension_numbers = #tpu.dot_dimension_numbers<[2], [2], [1], [1], [0, 0, 0, 1, 1, 1], [0], [0]>} : vector<8x8x16xf32>, vector<8x8x16xf32>, vector<8x8x8xf32> -> vector<8x8x8xf32>
    "tpu.trace_stop"() : () -> ()
    %cst_10 = arith.constant dense<0xFF800000> : vector<8x8xf32>
    %14 = vector.multi_reduction <maximumf>, %13, %cst_10 [2] : vector<8x8x8xf32> to vector<8x8xf32>
    %15 = vector.shape_cast %14 : vector<8x8xf32> to vector<8x8x1xf32>
    %16 = vector.broadcast %15 : vector<8x8x1xf32> to vector<8x8x8xf32>
    %17 = arith.subf %13, %16 : vector<8x8x8xf32>
    %18 = math.exp %17 : vector<8x8x8xf32>
    %cst_11 = arith.constant dense<0.000000e+00> : vector<8x8xf32>
    %19 = vector.multi_reduction <add>, %18, %cst_11 [2] : vector<8x8x8xf32> to vector<8x8xf32>
    %20 = vector.shape_cast %19 : vector<8x8xf32> to vector<8x8x1xf32>
    %21 = vector.broadcast %20 : vector<8x8x1xf32> to vector<8x8x8xf32>
    %22 = arith.divf %18, %21 : vector<8x8x8xf32>
    "tpu.trace_start"() <{level = 10 : i32, message = "blm,bmc->blc"}> : () -> ()
    %cst_12 = arith.constant dense<0.000000e+00> : vector<8x8x32xf32>
    %23 = tpu.matmul %22, %12, %cst_12 {dimension_numbers = #tpu.dot_dimension_numbers<[2], [1], [1], [2], [0, 0, 0, 1, 1, 2], [0], [0]>} : vector<8x8x8xf32>, vector<8x8x32xf32>, vector<8x8x32xf32> -> vector<8x8x32xf32>
    "tpu.trace_stop"() : () -> ()
    %24 = vector.shape_cast %6 : vector<64x32xf32> to vector<8x8x32xf32>
    %25 = arith.addf %23, %24 : vector<8x8x32xf32>
    %26 = vector.shape_cast %25 : vector<8x8x32xf32> to vector<64x32xf32>
    %c0_13 = arith.constant 0 : index
    %c256 = arith.constant 256 : index
    %27 = vector.load %arg3[%c0_13, %c256] : memref<32x384xf32, #tpu.memory_space<vmem>>, vector<32x48xf32>
    %cst_14 = arith.constant dense<0.000000e+00> : vector<64x48xf32>
    %28 = tpu.matmul %26, %27, %cst_14 {dimension_numbers = #tpu.dot_dimension_numbers<[1], [0], [0], [1], [0, 0, 1, 1], [], []>} : vector<64x32xf32>, vector<32x48xf32>, vector<64x48xf32> -> vector<64x48xf32>
    %29 = vector.shape_cast %28 : vector<64x48xf32> to vector<8x8x48xf32>
    %30 = vector.extract_strided_slice %29 {offsets = [0, 0, 0], sizes = [8, 8, 16], strides = [1, 1, 1]} : vector<8x8x48xf32> to vector<8x8x16xf32>
    %31 = vector.extract_strided_slice %29 {offsets = [0, 0, 16], sizes = [8, 8, 16], strides = [1, 1, 1]} : vector<8x8x48xf32> to vector<8x8x16xf32>
    %32 = vector.extract_strided_slice %29 {offsets = [0, 0, 32], sizes = [8, 8, 16], strides = [1, 1, 1]} : vector<8x8x48xf32> to vector<8x8x16xf32>
    %33 = tpu.iota {dimensions = array<i32: 1>} : vector<8x8x8xi32>
    %34 = tpu.iota {dimensions = array<i32: 2>} : vector<8x8x8xi32>
    %c1_i32 = arith.constant 1 : i32
    %35 = vector.broadcast %c1_i32 : i32 to vector<8x8x8xi32>
    %36 = arith.subi %33, %35 : vector<8x8x8xi32>
    %37 = arith.cmpi eq, %34, %36 : vector<8x8x8xi32>
    %38 = arith.extui %37 : vector<8x8x8xi1> to vector<8x8x8xi32>
    %39 = arith.sitofp %38 : vector<8x8x8xi32> to vector<8x8x8xf32>
    %c1_i32_15 = arith.constant 1 : i32
    %40 = vector.broadcast %c1_i32_15 : i32 to vector<8x8x8xi32>
    %41 = arith.addi %33, %40 : vector<8x8x8xi32>
    %42 = arith.cmpi eq, %34, %41 : vector<8x8x8xi32>
    %43 = arith.extui %42 : vector<8x8x8xi1> to vector<8x8x8xi32>
    %44 = arith.sitofp %43 : vector<8x8x8xi32> to vector<8x8x8xf32>
    "tpu.trace_start"() <{level = 10 : i32, message = "blm,bmc->blc"}> : () -> ()
    %cst_16 = arith.constant dense<0.000000e+00> : vector<8x8x16xf32>
    %45 = tpu.matmul %39, %30, %cst_16 {dimension_numbers = #tpu.dot_dimension_numbers<[2], [1], [1], [2], [0, 0, 0, 1, 1, 2], [0], [0]>} : vector<8x8x8xf32>, vector<8x8x16xf32>, vector<8x8x16xf32> -> vector<8x8x16xf32>
    "tpu.trace_stop"() : () -> ()
    %46 = arith.addf %45, %31 : vector<8x8x16xf32>
    "tpu.trace_start"() <{level = 10 : i32, message = "blm,bmc->blc"}> : () -> ()
    %cst_17 = arith.constant dense<0.000000e+00> : vector<8x8x16xf32>
    %47 = tpu.matmul %44, %32, %cst_17 {dimension_numbers = #tpu.dot_dimension_numbers<[2], [1], [1], [2], [0, 0, 0, 1, 1, 2], [0], [0]>} : vector<8x8x8xf32>, vector<8x8x16xf32>, vector<8x8x16xf32> -> vector<8x8x16xf32>
    "tpu.trace_stop"() : () -> ()
    %48 = arith.addf %46, %47 : vector<8x8x16xf32>
    %cst_18 = arith.constant 0.000000e+00 : f32
    %49 = vector.broadcast %cst_18 : f32 to vector<8x8x16xf32>
    %50 = arith.maximumf %48, %49 : vector<8x8x16xf32>
    %cst_19 = arith.constant dense<0.000000e+00> : vector<8x16xf32>
    %51 = vector.multi_reduction <add>, %50, %cst_19 [1] : vector<8x8x16xf32> to vector<8x16xf32>
    %cst_20 = arith.constant 1.250000e-01 : f32
    %52 = vector.broadcast %cst_20 : f32 to vector<8x16xf32>
    %53 = arith.mulf %51, %52 : vector<8x16xf32>
    %c0_21 = arith.constant 0 : index
    %c0_22 = arith.constant 0 : index
    %54 = vector.load %arg4[%c0_21, %c0_22] : memref<72x128xf32, #tpu.memory_space<vmem>>, vector<8x128xf32>
    %cst_23 = arith.constant dense<0.000000e+00> : vector<8x128xf32>
    %55 = tpu.matmul %0, %54, %cst_23 {dimension_numbers = #tpu.dot_dimension_numbers<[1], [0], [0], [1], [0, 0, 1, 1], [], []>} : vector<8x8xf32>, vector<8x128xf32>, vector<8x128xf32> -> vector<8x128xf32>
    %cst_24 = arith.constant 0.000000e+00 : f32
    %56 = vector.broadcast %cst_24 : f32 to vector<8x128xf32>
    %57 = arith.maximumf %55, %56 : vector<8x128xf32>
    %58 = vector.extract_strided_slice %57 {offsets = [0, 0], sizes = [8, 8], strides = [1, 1]} : vector<8x128xf32> to vector<8x8xf32>
    %c8 = arith.constant 8 : index
    %c0_25 = arith.constant 0 : index
    %59 = vector.load %arg4[%c8, %c0_25] : memref<72x128xf32, #tpu.memory_space<vmem>>, vector<8x128xf32>
    %cst_26 = arith.constant dense<0.000000e+00> : vector<8x128xf32>
    %60 = tpu.matmul %58, %59, %cst_26 {dimension_numbers = #tpu.dot_dimension_numbers<[1], [0], [0], [1], [0, 0, 1, 1], [], []>} : vector<8x8xf32>, vector<8x128xf32>, vector<8x128xf32> -> vector<8x128xf32>
    %cst_27 = arith.constant 0.000000e+00 : f32
    %61 = vector.broadcast %cst_27 : f32 to vector<8x128xf32>
    %62 = arith.maximumf %60, %61 : vector<8x128xf32>
    %63 = vector.extract_strided_slice %62 {offsets = [0, 0], sizes = [8, 8], strides = [1, 1]} : vector<8x128xf32> to vector<8x8xf32>
    %c16 = arith.constant 16 : index
    %c0_28 = arith.constant 0 : index
    %64 = vector.load %arg4[%c16, %c0_28] : memref<72x128xf32, #tpu.memory_space<vmem>>, vector<8x128xf32>
    %cst_29 = arith.constant dense<0.000000e+00> : vector<8x128xf32>
    %65 = tpu.matmul %63, %64, %cst_29 {dimension_numbers = #tpu.dot_dimension_numbers<[1], [0], [0], [1], [0, 0, 1, 1], [], []>} : vector<8x8xf32>, vector<8x128xf32>, vector<8x128xf32> -> vector<8x128xf32>
    %c24 = arith.constant 24 : index
    %c0_30 = arith.constant 0 : index
    %66 = vector.load %arg4[%c24, %c0_30] : memref<72x128xf32, #tpu.memory_space<vmem>>, vector<16x128xf32>
    %cst_31 = arith.constant dense<0.000000e+00> : vector<8x128xf32>
    %67 = tpu.matmul %53, %66, %cst_31 {dimension_numbers = #tpu.dot_dimension_numbers<[1], [0], [0], [1], [0, 0, 1, 1], [], []>} : vector<8x16xf32>, vector<16x128xf32>, vector<8x128xf32> -> vector<8x128xf32>
    %68 = arith.addf %65, %67 : vector<8x128xf32>
    %cst_32 = arith.constant 0.000000e+00 : f32
    %69 = vector.broadcast %cst_32 : f32 to vector<8x128xf32>
    %70 = arith.maximumf %68, %69 : vector<8x128xf32>
    %71 = vector.extract_strided_slice %70 {offsets = [0, 0], sizes = [8, 32], strides = [1, 1]} : vector<8x128xf32> to vector<8x32xf32>
    %c40 = arith.constant 40 : index
    %c0_33 = arith.constant 0 : index
    %72 = vector.load %arg4[%c40, %c0_33] : memref<72x128xf32, #tpu.memory_space<vmem>>, vector<32x128xf32>
    %cst_34 = arith.constant dense<0.000000e+00> : vector<8x128xf32>
    %73 = tpu.matmul %71, %72, %cst_34 {dimension_numbers = #tpu.dot_dimension_numbers<[1], [0], [0], [1], [0, 0, 1, 1], [], []>} : vector<8x32xf32>, vector<32x128xf32>, vector<8x128xf32> -> vector<8x128xf32>
    %74 = vector.extract_strided_slice %73 {offsets = [0, 0], sizes = [8, 3], strides = [1, 1]} : vector<8x128xf32> to vector<8x3xf32>
    %75 = vector.extract_strided_slice %55 {offsets = [0, 8], sizes = [8, 3], strides = [1, 1]} : vector<8x128xf32> to vector<8x3xf32>
    %76 = arith.addf %74, %75 : vector<8x3xf32>
    %cst_35 = arith.constant 0.000000e+00 : f32
    %77 = vector.broadcast %cst_35 : f32 to vector<8x3xf32>
    %78 = arith.maximumf %76, %77 : vector<8x3xf32>
    %79 = vector.extract_strided_slice %73 {offsets = [0, 8], sizes = [8, 2], strides = [1, 1]} : vector<8x128xf32> to vector<8x2xf32>
    %cst_36 = arith.constant dense<0xFF800000> : vector<8xf32>
    %80 = vector.multi_reduction <maximumf>, %79, %cst_36 [1] : vector<8x2xf32> to vector<8xf32>
    %81 = vector.shape_cast %80 : vector<8xf32> to vector<8x1xf32>
    %82 = vector.broadcast %81 : vector<8x1xf32> to vector<8x2xf32>
    %83 = arith.subf %79, %82 : vector<8x2xf32>
    %84 = math.exp %83 : vector<8x2xf32>
    %cst_37 = arith.constant dense<0.000000e+00> : vector<8xf32>
    %85 = vector.multi_reduction <add>, %84, %cst_37 [1] : vector<8x2xf32> to vector<8xf32>
    %86 = vector.shape_cast %85 : vector<8xf32> to vector<8x1xf32>
    %87 = math.log %86 : vector<8x1xf32>
    %88 = arith.addf %81, %87 : vector<8x1xf32>
    %89 = vector.broadcast %88 : vector<8x1xf32> to vector<8x2xf32>
    %90 = arith.subf %79, %89 : vector<8x2xf32>
    %91 = vector.extract_strided_slice %62 {offsets = [0, 0], sizes = [8, 4], strides = [1, 1]} : vector<8x128xf32> to vector<8x4xf32>
    %cst_38 = arith.constant 0.000000e+00 : f32
    %92 = vector.broadcast %cst_38 : f32 to vector<8x7xf32>
    %93 = tpu.concatenate %91, %53, %78, %90, %92 in 1 : vector<8x4xf32>, vector<8x16xf32>, vector<8x3xf32>, vector<8x2xf32>, vector<8x7xf32> -> vector<8x32xf32>
    %c0_39 = arith.constant 0 : index
    %c0_40 = arith.constant 0 : index
    %94 = vector.load %arg5[%c0_39, %c0_40] : memref<8x32xf32, #tpu.memory_space<vmem>>, vector<8x32xf32>
    tpu.vector_store %arg5[%c0_39, %c0_40], %93 {strides = array<i32>} : memref<8x32xf32, #tpu.memory_space<vmem>>, vector<8x32xf32>,
    return
  }
  func.func @transform_0(%arg0: i32) -> (i32, i32) {
    %c0_i32 = arith.constant 0 : i32
    %c0_i32_0 = arith.constant 0 : i32
    return %arg0, %c0_i32 : i32, i32
  }
  func.func @transform_1(%arg0: i32) -> (i32, i32, i32) {
    %c0_i32 = arith.constant 0 : i32
    %c0_i32_0 = arith.constant 0 : i32
    %c0_i32_1 = arith.constant 0 : i32
    return %arg0, %c0_i32, %c0_i32_0 : i32, i32, i32
  }
  func.func @transform_2(%arg0: i32) -> (i32, i32) {
    %c0_i32 = arith.constant 0 : i32
    %c0_i32_0 = arith.constant 0 : i32
    %c0_i32_1 = arith.constant 0 : i32
    return %c0_i32, %c0_i32_0 : i32, i32
  }
  func.func @transform_3(%arg0: i32) -> (i32, i32) {
    %c0_i32 = arith.constant 0 : i32
    %c0_i32_0 = arith.constant 0 : i32
    %c0_i32_1 = arith.constant 0 : i32
    return %c0_i32, %c0_i32_0 : i32, i32
  }
  func.func @transform_4(%arg0: i32) -> (i32, i32) {
    %c0_i32 = arith.constant 0 : i32
    %c0_i32_0 = arith.constant 0 : i32
    return %arg0, %c0_i32 : i32, i32
  }
}

</mosaic_0001>

<bundles_post_ra>
// kernel: tpu_custom_call.1
= control target key start
LH: loop header
LB: loop body
LE: loop exit
PB: predicated region body
PF: predicated region fallthrough
CT: control target
= control target key end

     0   :  { %9 = vsyncpa [#allocation3], 0  ;;  %s2213_s0 = inlined_call_operand.hbm [shape: f32[8,8], index: 0, kind: input, shape index: {}]   ;;  %s2214_s1 = inlined_call_operand.hbm [shape: f32[8,8,16], index: 1, kind: input, shape index: {}]   ;;  %s2215_s2 = inlined_call_operand.hbm [shape: f32[32,384], index: 2, kind: input, shape index: {}]   ;;  %s2216_s3 = inlined_call_operand.hbm [shape: f32[72,128], index: 3, kind: input, shape index: {}]   ;;  %s2217_s4 = inlined_call_operand.hbm [shape: f32[8,32], index: 4, kind: output, shape index: {}]  }
   0x1   :  { %10 = vsyncpa [#allocation6], 0 }
   0x2   :  { %11 = vsyncpa [#allocation9], 0  ;;  %s28_s17 = sshll.u32 %s2214_s1, 4  ;;  %s29_s17 = int_to_ptr.hbm [resolvable:$true] %s28_s17 }
   0x3   :  { %12 = vsyncpa [#allocation4], 0  ;;  %s1873_s18 = smov [#allocation5]   ;;  %s18_s22 = sshll.u32 %s2213_s0, 4  ;;  %s19_s22 = int_to_ptr.hbm [resolvable:$true] %s18_s22 }
   0x4   :  { %s30_s19 = sshll.u32 %s1873_s18, 4  ;;  %s1874_s23 = smov 128   ;;  %s31_s19 = int_to_ptr.vmem [resolvable:$true] %s30_s19 }
   0x5   :  { %s1875_s24 = smov 8   ;;  %s1876_s25 = smov [#allocation2]  }
   0x6   :  { %36 = dma.hbm_to_vmem [thread:$0]  %s29_s17, 1024, %s31_s19, [#allocation6], %s1874_s23, %s1874_s23, %s1875_s24  }
   0x7   :  { %s20_s26 = sshll.u32 %s1876_s25, 4  ;;  %s41_s29 = sshll.u32 %s2215_s2, 4  ;;  %s21_s26 = int_to_ptr.vmem [resolvable:$true] %s20_s26  ;;  %s42_s29 = int_to_ptr.hbm [resolvable:$true] %s41_s29 }
   0x8   :  { %23 = dma.hbm_to_vmem [thread:$0]  %s19_s22, 128, %s21_s26, [#allocation3]  }
   0x9   :  { %s1877_s1 = smov [#allocation7]   ;;  %s54_s0 = sshll.u32 %s2216_s3, 4  ;;  %s55_s0 = int_to_ptr.hbm [resolvable:$true] %s54_s0 }
   0xa   :  { %s43_s30 = sshll.u32 %s1877_s1, 4  ;;  %s1878_s7 = smov 384   ;;  %s44_s30 = int_to_ptr.vmem [resolvable:$true] %s43_s30 }
   0xb   :  { %s1879_s8 = smov 24   ;;  %s1880_s9 = smov [#allocation8]  }
   0xc   :  { %49 = dma.hbm_to_vmem [thread:$0]  %s42_s29, 1536, %s44_s30, [#allocation6], %s1878_s7, %s1878_s7, %s1879_s8  }
   0xd   :  { %s56_s10 = sshll.u32 %s1880_s9, 4  ;;  %s57_s10 = int_to_ptr.vmem [resolvable:$true] %s56_s10 }
   0xe   :  { %62 = dma.hbm_to_vmem [thread:$0]  %s55_s0, 1152, %s57_s10, [#allocation9], %s1874_s23, %s1874_s23, %s1875_s24  }
   0xf   :  { %1865 = dma.done.wait [#allocation3], 128  }
  0x10   :  { %1866 = vsyncadd [#allocation3], 4294967168 }
  0x11   :  { %1867 = dma.done.wait [#allocation6], 2560  }
  0x12   :  { %1868 = vsyncadd [#allocation6], 4294964736 }
  0x13   :  { %1869 = dma.done.wait [#allocation9], 1152  }
  0x14   :  { %1870 = vsyncadd [#allocation9], 4294966144  ;;  %v89_v0 = vld [vmem:[#allocation7 + $0x18] sm:$0xff]  ;;  %v88_v1 = vld [vmem:[#allocation7] sm:$0xff]  ;;  %vm90_vm0 = vcmask 130048   ;;  %vm168_vm1 = vcmask 261120  }
  0x15   :  { %129 = vmatpush.msra.mxu0 %v89_v0  ;;  %v80_v2 = vld [vmem:[#allocation5] sm:$0xff]  ;;  %v81_v3 = vld [vmem:[#allocation5 + $0x8] sm:$0xff]  ;;  %v82_v4 = vld [vmem:[#allocation5 + $0x10] sm:$0xff]  ;;  %s1881_s2 = smov 112   ;;  %vm450_vm2 = vcmask 64512   ;;  %s1882_s3 = smov 96  }
  0x16   :  { %v83_v5 = vld [vmem:[#allocation5 + $0x18] sm:$0xff]  ;;  %v167_v6 = vld [vmem:[#allocation7 + $0x50] sm:$0xff]  ;;  %v84_v8 = vld [vmem:[#allocation5 + $0x20] sm:$0xff]  ;;  %s1884_s11 = smov 120   ;;  %s1885_s12 = smov 4  }
  0x17   :  { %130 = vmatpush.msra.mxu0 %v88_v1  ;;  %v166_v7 = vld [vmem:[#allocation7 + $0x38] sm:$0xff]  ;;  %205 = vmatpush.msra.mxu1 %v167_v6  ;;  %v85_v9 = vld [vmem:[#allocation5 + $0x28] sm:$0xff]  ;;  %v86_v10 = vld [vmem:[#allocation5 + $0x30] sm:$0xff]  ;;  %s1886_s13 = smov 20   ;;  %s1887_s14 = smov 15  }
  0x18   :  { %1606 = vmatmul.msk.f32.vlgmr.msra.gmra.mxu0 %vm90_vm0, %v80_v2  ;;  %v87_v11 = vld [vmem:[#allocation5 + $0x38] sm:$0xff]  ;;  %v165_v12 = vld [vmem:[#allocation7 + $0x20] sm:$0xff]  ;;  %v164_v13 = vld [vmem:[#allocation7 + $0x8] sm:$0xff]  ;;  %s1888_s15 = smov [#allocation10]   ;;  %s1594_s19 = sshll.u32 %s2217_s4, 4  ;;  %s1595_s19 = int_to_ptr.hbm [resolvable:$true] %s1594_s19 }
  0x19   :  { %206 = vmatpush.msra.mxu1 %v166_v7  ;;  %s1592_s16 = sshll.u32 %s1888_s15, 4  ;;  %s1593_s16 = int_to_ptr.vmem [resolvable:$true] %s1592_s16 }
  0x1b   :  { %207 = vmatpush.msra.mxu1 %v165_v12 }
  0x1d   :  { %208 = vmatpush.msra.mxu1 %v164_v13 }
  0x20   :  { %1607 = vmatmul.msk.f32.gmra.mxu0 %vm90_vm0, %v81_v3 }
  0x28   :  { %1608 = vmatmul.msk.f32.gmra.mxu0 %vm90_vm0, %v82_v4 }
  0x30   :  { %1609 = vmatmul.msk.f32.gmra.mxu0 %vm90_vm0, %v83_v5 }
  0x38   :  { %1610 = vmatmul.msk.f32.gmra.mxu0 %vm90_vm0, %v84_v8 }
  0x40   :  { %1611 = vmatmul.msk.f32.gmra.mxu0 %vm90_vm0, %v85_v9 }
  0x48   :  { %1612 = vmatmul.msk.f32.gmra.mxu0 %vm90_vm0, %v86_v10 }
  0x50   :  { %1613 = vmatmul.msk.f32.gmra.mxu0 %vm90_vm0, %v87_v11 }
  0x95   :  { %v1934_v14 = vpop.f32.mrf.mxu0 }
  0x96   :  { %v156_v15 = vmax.f32 %v1934_v14, 0.0 }
  0x98   :  { %1614 = vmatmul.msk.f32.vlgmr.msra.gmra.mxu1 %vm168_vm1, %v156_v15 }
  0x9d   :  { %v1940_v16 = vpop.f32.mrf.mxu0 }
  0x9e   :  { %v157_v17 = vmax.f32 %v1940_v16, 0.0 }
  0xa0   :  { %1615 = vmatmul.msk.f32.gmra.mxu1 %vm168_vm1, %v157_v17 }
  0xa5   :  { %v1946_v18 = vpop.f32.mrf.mxu0 }
  0xa6   :  { %v158_v19 = vmax.f32 %v1946_v18, 0.0 }
  0xa8   :  { %1616 = vmatmul.msk.f32.gmra.mxu1 %vm168_vm1, %v158_v19 }
  0xad   :  { %v1952_v20 = vpop.f32.mrf.mxu0 }
  0xae   :  { %v159_v21 = vmax.f32 %v1952_v20, 0.0 }
  0xb0   :  { %1617 = vmatmul.msk.f32.gmra.mxu1 %vm168_vm1, %v159_v21 }
  0xb5   :  { %v1958_v22 = vpop.f32.mrf.mxu0 }
  0xb6   :  { %v160_v23 = vmax.f32 %v1958_v22, 0.0  ;;  %v920_v22 = vlaneseq }
  0xb8   :  { %1618 = vmatmul.msk.f32.gmra.mxu1 %vm168_vm1, %v160_v23 }
  0xbd   :  { %v1964_v24 = vpop.f32.mrf.mxu0 }
  0xbe   :  { %v161_v25 = vmax.f32 %v1964_v24, 0.0 }
  0xc0   :  { %1619 = vmatmul.msk.f32.gmra.mxu1 %vm168_vm1, %v161_v25 }
  0xc5   :  { %v1970_v26 = vpop.f32.mrf.mxu0 }
  0xc6   :  { %v162_v27 = vmax.f32 %v1970_v26, 0.0 }
  0xc8   :  { %1620 = vmatmul.msk.f32.gmra.mxu1 %vm168_vm1, %v162_v27 }
  0xcd   :  { %v1976_v28 = vpop.f32.mrf.mxu0 }
  0xce   :  { %v163_v29 = vmax.f32 %v1976_v28, 0.0 }
  0xd0   :  { %1621 = vmatmul.msk.f32.gmra.mxu1 %vm168_vm1, %v163_v29 }
 0x115   :  { %v1982_v30 = vpop.f32.mrf.mxu1 }
 0x116   :  { %235 = vrot.lane.b32.xlu0 %v1982_v30, %s1881_s2 }
 0x11d   :  { %v213_v31 = vpop.f32.mrf.mxu1 }
 0x11e   :  { %262 = vrot.lane.b32.xlu0 %v213_v31, %s1881_s2  ;;  %v1694_v60 = vpack.i.bf16 %v213_v31, %v1982_v30 }
 0x125   :  { %v1987_v32 = vpop.f32.mrf.mxu1 }
 0x126   :  { %289 = vrot.lane.b32.xlu1 %v1987_v32, %s1881_s2 }
 0x12d   :  { %v1991_v33 = vpop.f32.mrf.mxu1 }
 0x12e   :  { %316 = vrot.lane.b32.xlu1 %v1991_v33, %s1881_s2 }
 0x135   :  { %v1995_v34 = vpop.f32.mrf.mxu1 }
 0x136   :  { %343 = vrot.lane.b32.xlu2 %v1995_v34, %s1881_s2 }
 0x13d   :  { %v1999_v35 = vpop.f32.mrf.mxu1 }
 0x13e   :  { %370 = vrot.lane.b32.xlu2 %v1999_v35, %s1881_s2 }
 0x145   :  { %v2003_v36 = vpop.f32.mrf.mxu1 }
 0x146   :  { %397 = vrot.lane.b32.xlu0 %v2003_v36, %s1881_s2 }
 0x14d   :  { %v2007_v37 = vpop.f32.mrf.mxu1 }
 0x14e   :  { %424 = vrot.lane.b32.xlu1 %v2007_v37, %s1881_s2 }
 0x188   :  { %v236_v38 = vpop.permute.xlu0 %235 }
 0x189   :  { %1622 = vmatpush.xpose.msk.msra.mxu2 %vm90_vm0, %v236_v38 }
 0x18c   :  { %1623 = vmatmul.msk.f32.vlgmr.msra.gmra.mxu2 %vm90_vm0, %v1982_v30 }
 0x190   :  { %v263_v39 = vpop.permute.xlu0 %262  ;;  %v344_v40 = vpop.permute.xlu2 %343 }
 0x191   :  { %1624 = vmatpush.xpose.msk.msra.mxu3 %vm90_vm0, %v263_v39 }
 0x194   :  { %1625 = vmatmul.msk.f32.vlgmr.msra.gmra.mxu3 %vm90_vm0, %v213_v31 }
 0x198   :  { %v290_v41 = vpop.permute.xlu1 %289  ;;  %v371_v42 = vpop.permute.xlu2 %370 }
 0x199   :  { %1626 = vmatpush.xpose.msk.msrb.mxu2 %vm90_vm0, %v290_v41 }
 0x19c   :  { %1627 = vmatmul.msk.f32.vlgmr.msrb.gmra.mxu2 %vm90_vm0, %v1987_v32 }
 0x19d   :  { %1630 = vmatpush.xpose.msk.msra.mxu2 %vm90_vm0, %v344_v40 }
 0x1a0   :  { %v317_v43 = vpop.permute.xlu1 %316 }
 0x1a1   :  { %1628 = vmatpush.xpose.msk.msrb.mxu3 %vm90_vm0, %v317_v43 }
 0x1a4   :  { %1629 = vmatmul.msk.f32.vlgmr.msrb.gmra.mxu3 %vm90_vm0, %v1991_v33  ;;  %1631 = vmatmul.msk.f32.vlgmr.msra.gmra.mxu2 %vm90_vm0, %v1995_v34 }
 0x1a5   :  { %1632 = vmatpush.xpose.msk.msra.mxu3 %vm90_vm0, %v371_v42 }
 0x1ac   :  { %1633 = vmatmul.msk.f32.vlgmr.msra.gmra.mxu3 %vm90_vm0, %v1999_v35 }
 0x1b8   :  { %v398_v44 = vpop.permute.xlu0 %397 }
 0x1b9   :  { %1634 = vmatpush.xpose.msk.msrb.mxu2 %vm90_vm0, %v398_v44 }
 0x1bc   :  { %1635 = vmatmul.msk.f32.vlgmr.msrb.gmra.mxu2 %vm90_vm0, %v2003_v36 }
 0x1c0   :  { %v425_v45 = vpop.permute.xlu1 %424 }
 0x1c1   :  { %1636 = vmatpush.xpose.msk.msrb.mxu3 %vm90_vm0, %v425_v45 }
 0x1c4   :  { %1637 = vmatmul.msk.f32.vlgmr.msrb.gmra.mxu3 %vm90_vm0, %v2007_v37 }
 0x20f   :  { %v258_v46 = vpop.f32.mrf.mxu2 }
 0x210   :  { %v451_v47 = vsel %vm450_vm2, %v258_v46, -inf }
 0x211   :  { %452 = vmax.xlane.f32.xlu2 %v451_v47 }
 0x217   :  { %v285_v48 = vpop.f32.mrf.mxu3 }
 0x218   :  { %v454_v49 = vsel %vm450_vm2, %v285_v48, -inf }
 0x219   :  { %455 = vmax.xlane.f32.xlu0 %v454_v49 }
 0x21f   :  { %v312_v50 = vpop.f32.mrf.mxu2 }
 0x220   :  { %v457_v51 = vsel %vm450_vm2, %v312_v50, -inf }
 0x221   :  { %458 = vmax.xlane.f32.xlu1 %v457_v51 }
 0x227   :  { %v339_v52 = vpop.f32.mrf.mxu3  ;;  %v366_v54 = vpop.f32.mrf.mxu2 }
 0x228   :  { %v460_v53 = vsel %vm450_vm2, %v339_v52, -inf  ;;  %v463_v56 = vsel %vm450_vm2, %v366_v54, -inf }
 0x229   :  { %461 = vmax.xlane.f32.xlu2 %v460_v53 }
 0x22f   :  { %v393_v55 = vpop.f32.mrf.mxu3 }
 0x230   :  { %v466_v57 = vsel %vm450_vm2, %v393_v55, -inf }
 0x231   :  { %464 = vmax.xlane.f32.xlu2 %v463_v56  ;;  %467 = vmax.xlane.f32.xlu0 %v466_v57  ;;  %v1699_v57 = vpack.i.bf16 %v1991_v33, %v1987_v32 }
 0x23f   :  { %v420_v58 = vpop.f32.mrf.mxu2 }
 0x240   :  { %v469_v59 = vsel %vm450_vm2, %v420_v58, -inf }
 0x241   :  { %470 = vmax.xlane.f32.xlu2 %v469_v59 }
 0x245   :  { %1695 = vrot.lane.b32.xlu0 %v1694_v60, %s1882_s3 }
 0x247   :  { %v2043_v61 = vpop.f32.mrf.mxu3 }
 0x248   :  { %v472_v62 = vsel %vm450_vm2, %v2043_v61, -inf }
 0x249   :  { %473 = vmax.xlane.f32.xlu1 %v472_v62 }
 0x284   :  { %v453_v63 = vpop.xlane.xlu2 %452 }
 0x285   :  { %v475_v0 = vsub.f32 %v258_v46, %v453_v63  ;;  %v1704_v46 = vpack.i.bf16 %v1999_v35, %v1995_v34 }
 0x287   :  { %v483_v1 = vmul.f32 1.442695, %v475_v0 }
 0x289   :  { %1709 = vpow2.f32 %v483_v1 }
 0x28c   :  { %v456_v2 = vpop.xlane.xlu0 %455 }
 0x28d   :  { %v476_v3 = vsub.f32 %v285_v48, %v456_v2 }
 0x28f   :  { %v2047_v4 = vpop.eup %1709  ;;  %v485_v5 = vmul.f32 1.442695, %v476_v3 }
 0x290   :  { %v499_v6 = vsel %vm450_vm2, %v2047_v4, 0.0 }
 0x291   :  { %1711 = vpow2.f32 %v485_v5  ;;  %500 = vadd.xlane.f32.xlu1 %v499_v6 }
 0x294   :  { %v459_v7 = vpop.xlane.xlu1 %458 }
 0x295   :  { %v477_v8 = vsub.f32 %v312_v50, %v459_v7 }
 0x297   :  { %v2051_v9 = vpop.eup %1711  ;;  %v487_v10 = vmul.f32 1.442695, %v477_v8 }
 0x298   :  { %v502_v11 = vsel %vm450_vm2, %v2051_v9, 0.0 }
 0x299   :  { %1713 = vpow2.f32 %v487_v10  ;;  %503 = vadd.xlane.f32.xlu0 %v502_v11 }
 0x29c   :  { %v462_v12 = vpop.xlane.xlu2 %461 }
 0x29d   :  { %v478_v13 = vsub.f32 %v339_v52, %v462_v12 }
 0x29f   :  { %v2055_v30 = vpop.eup %1713  ;;  %v489_v31 = vmul.f32 1.442695, %v478_v13 }
 0x2a0   :  { %v505_v38 = vsel %vm450_vm2, %v2055_v30, 0.0 }
 0x2a1   :  { %1715 = vpow2.f32 %v489_v31  ;;  %506 = vadd.xlane.f32.xlu2 %v505_v38 }
 0x2a4   :  { %v465_v39 = vpop.xlane.xlu2 %464  ;;  %v468_v40 = vpop.xlane.xlu0 %467 }
 0x2a5   :  { %v479_v41 = vsub.f32 %v366_v54, %v465_v39  ;;  %v480_v44 = vsub.f32 %v393_v55, %v468_v40 }
 0x2a7   :  { %v2059_v42 = vpop.eup %1715  ;;  %v491_v43 = vmul.f32 1.442695, %v479_v41  ;;  %v493_v47 = vmul.f32 1.442695, %v480_v44 }
 0x2a8   :  { %v508_v45 = vsel %vm450_vm2, %v2059_v42, 0.0 }
 0x2a9   :  { %1717 = vpow2.f32 %v491_v43  ;;  %509 = vadd.xlane.f32.xlu1 %v508_v45 }
 0x2aa   :  { %1719 = vpow2.f32 %v493_v47 }
 0x2ad   :  { %1705 = vrot.lane.b32.xlu0 %v1704_v46, %s1882_s3 }
 0x2af   :  { %v2066_v48 = vpop.eup %1717 }
 0x2b0   :  { %v511_v49 = vsel %vm450_vm2, %v2066_v48, 0.0  ;;  %v2070_v51 = vpop.eup %1719 }
 0x2b1   :  { %512 = vadd.xlane.f32.xlu2 %v511_v49  ;;  %v514_v34 = vsel %vm450_vm2, %v2070_v51, 0.0 }
 0x2b4   :  { %v471_v50 = vpop.xlane.xlu2 %470 }
 0x2b5   :  { %v481_v52 = vsub.f32 %v420_v58, %v471_v50 }
 0x2b7   :  { %v495_v53 = vmul.f32 1.442695, %v481_v52  ;;  %v1696_v54 = vpop.permute.xlu0 %1695 }
 0x2b8   :  { %v1698_v55 = vunpack.i.h.bf16 %v1696_v54  ;;  %v1697_v56 = vunpack.i.l.bf16 %v1696_v54 }
 0x2b9   :  { %1721 = vpow2.f32 %v495_v53  ;;  %515 = vadd.xlane.f32.xlu2 %v514_v34 }
 0x2ba   :  { %664 = vmatpush.msra.mxu2 %v1697_v56  ;;  %690 = vmatpush.msra.mxu3 %v1698_v55 }
 0x2bc   :  { %v474_v58 = vpop.xlane.xlu1 %473 }
 0x2bd   :  { %v482_v60 = vsub.f32 %v2043_v61, %v474_v58 }
 0x2bf   :  { %v2074_v35 = vpop.eup %1721  ;;  %v497_v62 = vmul.f32 1.442695, %v482_v60 }
 0x2c0   :  { %v517_v59 = vsel %vm450_vm2, %v2074_v35, 0.0 }
 0x2c1   :  { %518 = vadd.xlane.f32.xlu2 %v517_v59  ;;  %1723 = vpow2.f32 %v497_v62 }
 0x2c2   :  { %1700 = vrot.lane.b32.xlu1 %v1699_v57, %s1882_s3 }
 0x2c7   :  { %v2084_v63 = vpop.eup %1723 }
 0x2c8   :  { %v520_v0 = vsel %vm450_vm2, %v2084_v63, 0.0 }
 0x2ca   :  { %825 = vrot.lane.b32.xlu1 %v2007_v37, %s1882_s3 }
 0x2d7   :  { %521 = vadd.xlane.f32.xlu0 %v520_v0 }
 0x2d9   :  { %799 = vrot.lane.b32.xlu2 %v2003_v36, %s1882_s3 }
 0x304   :  { %v501_v32 = vpop.xlane.xlu1 %500 }
 0x305   :  { %1725 = vrcp.f32 %v501_v32  ;;  %v534_v3 = vand.u32 2147483648, %v501_v32  ;;  %v532_v37 = vand.u32 2147483647, %v501_v32  ;;  %vm528_vm4 = vweird.f32 %v501_v32 }
 0x307   :  { %v535_v8 = vor.u32 1.1754944e-38, %v534_v3  ;;  %vm533_vm6 = vcmp.eq.f32.partialorder %v532_v37, 8.507059e+37 }
 0x30b   :  { %v1726_v33 = vpop.eup %1725 }
 0x30c   :  { %v524_v1 = vmul.f32 %v1726_v33, %v501_v32  ;;  %v504_v2 = vpop.xlane.xlu0 %503  ;;  %vm529_vm3 = vweird.f32 %v1726_v33 }
 0x30d   :  { %1727 = vrcp.f32 %v504_v2  ;;  %vm530_vm5 = vmor %vm528_vm4, %vm529_vm3  ;;  %v549_v38 = vand.u32 2147483648, %v504_v2  ;;  %v547_v40 = vand.u32 2147483647, %v504_v2  ;;  %vm543_vm8 = vweird.f32 %v504_v2 }
 0x30e   :  { %v525_v61 = vsub.f32 1.0, %v524_v1 }
 0x30f   :  { %v550_v43 = vor.u32 1.1754944e-38, %v549_v38  ;;  %vm548_vm10 = vcmp.eq.f32.partialorder %v547_v40, 8.507059e+37 }
 0x310   :  { %v526_v5 = vmul.f32 %v1726_v33, %v525_v61 }
 0x312   :  { %v527_v6 = vadd.f32 %v1726_v33, %v526_v5 }
 0x313   :  { %v1728_v7 = vpop.eup %1727 }
 0x314   :  { %v531_v10 = vsel %vm530_vm5, %v1726_v33, %v527_v6  ;;  %v539_v11 = vmul.f32 %v1728_v7, %v504_v2  ;;  %v507_v12 = vpop.xlane.xlu2 %506  ;;  %vm544_vm7 = vweird.f32 %v1728_v7 }
 0x315   :  { %v536_v36 = vsel %vm533_vm6, %v535_v8, %v531_v10  ;;  %1729 = vrcp.f32 %v507_v12  ;;  %vm545_vm9 = vmor %vm543_vm8, %vm544_vm7  ;;  %vm558_vm13 = vweird.f32 %v507_v12  ;;  %v564_v62 = vand.u32 2147483648, %v507_v12 }
 0x316   :  { %v540_v13 = vsub.f32 1.0, %v539_v11  ;;  %v537_v31 = vmul.f32 %v2047_v4, %v536_v36  ;;  %v562_v33 = vand.u32 2147483647, %v507_v12 }
 0x317   :  { %v565_v37 = vor.u32 1.1754944e-38, %v564_v62 }
 0x318   :  { %v541_v39 = vmul.f32 %v1728_v7, %v540_v13  ;;  %1638 = vmatmul.msk.f32.vlgmr.msra.gmra.mxu2 %vm450_vm2, %v537_v31  ;;  %vm563_vm4 = vcmp.eq.f32.partialorder %v562_v33, 8.507059e+37  ;;  %v853_v33 = vld [vmem:[#allocation7 + $0x40] sm:$0xff] }
 0x31a   :  { %v542_v41 = vadd.f32 %v1728_v7, %v541_v39 }
 0x31b   :  { %v1730_v47 = vpop.eup %1729 }
 0x31c   :  { %v546_v44 = vsel %vm545_vm9, %v1728_v7, %v542_v41  ;;  %v510_v45 = vpop.xlane.xlu1 %509  ;;  %v554_v4 = vmul.f32 %v1730_v47, %v507_v12  ;;  %vm559_vm11 = vweird.f32 %v1730_v47 }
 0x31d   :  { %v551_v46 = vsel %vm548_vm10, %v550_v43, %v546_v44  ;;  %1731 = vrcp.f32 %v510_v45  ;;  %v579_v0 = vand.u32 2147483648, %v510_v45  ;;  %vm560_vm14 = vmor %vm558_vm13, %vm559_vm11  ;;  %vm573_vm15 = vweird.f32 %v510_v45 }
 0x31e   :  { %v552_v49 = vmul.f32 %v2051_v9, %v551_v46  ;;  %v555_v54 = vsub.f32 1.0, %v554_v4  ;;  %v577_v1 = vand.u32 2147483647, %v510_v45 }
 0x31f   :  { %v1706_v3 = vpop.permute.xlu0 %1705  ;;  %v580_v6 = vor.u32 1.1754944e-38, %v579_v0  ;;  %v854_v0 = vld [vmem:[#allocation7 + $0x58] sm:$0xff] }
 0x320   :  { %1639 = vmatmul.msk.f32.vlgmr.msra.gmra.mxu3 %vm450_vm2, %v552_v49  ;;  %v556_v56 = vmul.f32 %v1730_v47, %v555_v54  ;;  %vm578_vm5 = vcmp.eq.f32.partialorder %v577_v1, 8.507059e+37  ;;  %v1708_v11 = vunpack.i.h.bf16 %v1706_v3  ;;  %891 = vmatpush.msrb.mxu0 %v854_v0 }
 0x322   :  { %v557_v58 = vadd.f32 %v1730_v47, %v556_v56  ;;  %892 = vmatpush.msrb.mxu0 %v853_v33 }
 0x323   :  { %v1732_v50 = vpop.eup %1731 }
 0x324   :  { %v569_v52 = vmul.f32 %v1732_v50, %v510_v45  ;;  %v2094_v53 = vpop.xlane.xlu2 %512  ;;  %vm574_vm12 = vweird.f32 %v1732_v50  ;;  %v561_v2 = vsel %vm560_vm14, %v1730_v47, %v557_v58  ;;  %v1707_v47 = vunpack.i.l.bf16 %v1706_v3 }
 0x325   :  { %1733 = vrcp.f32 %v2094_v53  ;;  %vm575_vm3 = vmor %vm573_vm15, %vm574_vm12  ;;  %v566_v8 = vsel %vm563_vm4, %v565_v37, %v561_v2  ;;  %vm588_vm6 = vweird.f32 %v2094_v53  ;;  %v594_v38 = vand.u32 2147483648, %v2094_v53 }
 0x326   :  { %v570_v55 = vsub.f32 1.0, %v569_v52  ;;  %v592_v43 = vand.u32 2147483647, %v2094_v53  ;;  %v567_v45 = vmul.f32 %v2055_v30, %v566_v8 }
 0x327   :  { %v595_v30 = vor.u32 1.1754944e-38, %v594_v38 }
 0x328   :  { %v571_v34 = vmul.f32 %v1732_v50, %v570_v55  ;;  %vm593_vm11 = vcmp.eq.f32.partialorder %v592_v43, 8.507059e+37 }
 0x32a   :  { %v572_v60 = vadd.f32 %v1732_v50, %v571_v34 }
 0x32b   :  { %v2097_v57 = vpop.eup %1733 }
 0x32c   :  { %v584_v59 = vmul.f32 %v2097_v57, %v2094_v53  ;;  %v2101_v9 = vpop.xlane.xlu2 %515  ;;  %v576_v61 = vsel %vm575_vm3, %v1732_v50, %v572_v60  ;;  %vm589_vm7 = vweird.f32 %v2097_v57 }
 0x32d   :  { %1735 = vrcp.f32 %v2101_v9  ;;  %v581_v10 = vsel %vm578_vm5, %v580_v6, %v576_v61  ;;  %v609_v44 = vand.u32 2147483648, %v2101_v9  ;;  %vm2114_vm8 = vmor %vm588_vm6, %vm589_vm7  ;;  %v607_v50 = vand.u32 2147483647, %v2101_v9  ;;  %v852_v61 = vld [vmem:[#allocation7 + $0x28] sm:$0xff] }
 0x32e   :  { %v585_v32 = vsub.f32 1.0, %v584_v59  ;;  %v582_v46 = vmul.f32 %v2059_v42, %v581_v10  ;;  %vm603_vm10 = vweird.f32 %v2101_v9  ;;  %893 = vmatpush.msrb.mxu0 %v852_v61 }
 0x32f   :  { %v610_v54 = vor.u32 1.1754944e-38, %v609_v44  ;;  %vm608_vm13 = vcmp.eq.f32.partialorder %v607_v50, 8.507059e+37 }
 0x330   :  { %v586_v5 = vmul.f32 %v2097_v57, %v585_v32 }
 0x332   :  { %v587_v31 = vadd.f32 %v2097_v57, %v586_v5 }
 0x333   :  { %v1736_v7 = vpop.eup %1735 }
 0x334   :  { %v599_v36 = vmul.f32 %v1736_v7, %v2101_v9  ;;  %v519_v13 = vpop.xlane.xlu2 %518  ;;  %v1701_v12 = vpop.permute.xlu1 %1700  ;;  %vm604_vm9 = vweird.f32 %v1736_v7  ;;  %v591_v52 = vsel %vm2114_vm8, %v2097_v57, %v587_v31 }
 0x335   :  { %1737 = vrcp.f32 %v519_v13  ;;  %v1703_v40 = vunpack.i.h.bf16 %v1701_v12  ;;  %v1702_v41 = vunpack.i.l.bf16 %v1701_v12  ;;  %vm605_vm12 = vmor %vm603_vm10, %vm604_vm9  ;;  %v596_v55 = vsel %vm593_vm11, %v595_v30, %v591_v52 }
 0x336   :  { %v600_v39 = vsub.f32 1.0, %v599_v36  ;;  %v624_v9 = vand.u32 2147483648, %v519_v13  ;;  %v597_v32 = vmul.f32 %v2066_v48, %v596_v55  ;;  %v622_v2 = vand.u32 2147483647, %v519_v13 }
 0x337   :  { %716 = vmatpush.msrb.mxu2 %v1702_v41  ;;  %742 = vmatpush.msrb.mxu3 %v1703_v40  ;;  %vm618_vm15 = vweird.f32 %v519_v13  ;;  %v851_v40 = vld [vmem:[#allocation7 + $0x10] sm:$0xff]  ;;  %vm1455_vm11 = vcmask 1041409  }
 0x338   :  { %v601_v4 = vmul.f32 %v1736_v7, %v600_v39  ;;  %1640 = vmatmul.msk.f32.vlgmr.msrb.gmra.mxu2 %vm450_vm2, %v567_v45  ;;  %1641 = vmatmul.msk.f32.vlgmr.msrb.gmra.mxu3 %vm450_vm2, %v582_v46  ;;  %v625_v5 = vor.u32 1.1754944e-38, %v624_v9  ;;  %vm623_vm4 = vcmp.eq.f32.partialorder %v622_v2, 8.507059e+37 }
 0x339   :  { %768 = vmatpush.msra.mxu2 %v1707_v47  ;;  %794 = vmatpush.msra.mxu3 %v1708_v11 }
 0x33a   :  { %v602_v42 = vadd.f32 %v1736_v7, %v601_v4  ;;  %894 = vmatpush.msrb.mxu0 %v851_v40  ;;  %v923_v4 = vand.u32 127, %v920_v22 }
 0x33b   :  { %v1738_v53 = vpop.eup %1737 }
 0x33c   :  { %v606_v56 = vsel %vm605_vm12, %v1736_v7, %v602_v42  ;;  %v614_v34 = vmul.f32 %v1738_v53, %v519_v13  ;;  %v800_v59 = vpop.permute.xlu2 %799  ;;  %v826_v57 = vpop.permute.xlu1 %825  ;;  %vm619_vm14 = vweird.f32 %v1738_v53  ;;  %vm1457_vm12 = vcmask 1042434  }
 0x33d   :  { %v611_v58 = vsel %vm608_vm13, %v610_v54, %v606_v56  ;;  %820 = vmatpush.msrb.mxu2 %v800_v59  ;;  %846 = vmatpush.msrb.mxu3 %v826_v57  ;;  %vm620_vm3 = vmor %vm618_vm15, %vm619_vm14  ;;  %vm1459_vm13 = vcmask 1043459   ;;  %vm1461_vm14 = vcmask 1044484   ;;  %vm1463_vm15 = vcmask 1045509  }
 0x33e   :  { %v615_v60 = vsub.f32 1.0, %v614_v34  ;;  %v612_v62 = vmul.f32 %v2070_v51, %v611_v58  ;;  %v1394_v58 = vld [vmem:[#allocation8] sm:$0xff] }
 0x340   :  { %v616_v1 = vmul.f32 %v1738_v53, %v615_v60  ;;  %1642 = vmatmul.msk.f32.vlgmr.msra.gmra.mxu2 %vm450_vm2, %v597_v32  ;;  %1643 = vmatmul.msk.f32.vlgmr.msra.gmra.mxu3 %vm450_vm2, %v612_v62  ;;  %v79_v60 = vld [vmem:[#allocation2] sm:$0xff] }
 0x342   :  { %v617_v3 = vadd.f32 %v1738_v53, %v616_v1 }
 0x344   :  { %v621_v51 = vsel %vm620_vm3, %v1738_v53, %v617_v3  ;;  %vm1465_vm3 = vcmask 1046534  }
 0x345   :  { %v626_v37 = vsel %vm623_vm4, %v625_v5, %v621_v51  ;;  %v1419_v51 = vld [vmem:[#allocation8 + $0x8] sm:$0xff]  ;;  %vm1467_vm4 = vcmask 1047559  }
 0x346   :  { %v627_v48 = vmul.f32 %v2074_v35, %v626_v37 }
 0x348   :  { %1644 = vmatmul.msk.f32.vlgmr.msrb.gmra.mxu2 %vm450_vm2, %v627_v48 }
 0x34a   :  { %v522_v6 = vpop.xlane.xlu0 %521 }
 0x34b   :  { %1739 = vrcp.f32 %v522_v6  ;;  %v639_v11 = vand.u32 2147483648, %v522_v6  ;;  %v637_v13 = vand.u32 2147483647, %v522_v6  ;;  %vm633_vm6 = vweird.f32 %v522_v6 }
 0x34d   :  { %v640_v31 = vor.u32 1.1754944e-38, %v639_v11  ;;  %vm638_vm8 = vcmp.eq.f32.partialorder %v637_v13, 8.507059e+37 }
 0x351   :  { %v1740_v7 = vpop.eup %1739 }
 0x352   :  { %v629_v8 = vmul.f32 %v1740_v7, %v522_v6  ;;  %vm634_vm5 = vweird.f32 %v1740_v7 }
 0x353   :  { %vm635_vm7 = vmor %vm633_vm6, %vm634_vm5  ;;  %vm1578_vm5 = vcmask 31744   ;;  %vm1580_vm6 = vcmask 162816  }
 0x354   :  { %v630_v10 = vsub.f32 1.0, %v629_v8 }
 0x356   :  { %v631_v36 = vmul.f32 %v1740_v7, %v630_v10 }
 0x358   :  { %v632_v12 = vadd.f32 %v1740_v7, %v631_v36 }
 0x35a   :  { %v636_v38 = vsel %vm635_vm7, %v1740_v7, %v632_v12  ;;  %vm1582_vm7 = vcmask 187392  }
 0x35b   :  { %v641_v39 = vsel %vm638_vm8, %v640_v31, %v636_v38  ;;  %vm1584_vm8 = vcmask 203776  }
 0x35c   :  { %v642_v35 = vmul.f32 %v2084_v63, %v641_v39 }
 0x35e   :  { %1645 = vmatmul.msk.f32.vlgmr.msrb.gmra.mxu3 %vm450_vm2, %v642_v35 }
 0x39b   :  { %v666_v41 = vpop.f32.mrf.mxu2 }
 0x39c   :  { %v667_v43 = vadd.f32 %v666_v41, %v156_v15 }
 0x39e   :  { %1646 = vmatmul.msk.f32.vlgmr.msrb.gmra.mxu0 %vm168_vm1, %v667_v43 }
 0x3a3   :  { %v692_v44 = vpop.f32.mrf.mxu3 }
 0x3a4   :  { %v693_v45 = vadd.f32 %v692_v44, %v157_v17 }
 0x3a6   :  { %1647 = vmatmul.msk.f32.gmra.mxu0 %vm168_vm1, %v693_v45 }
 0x3bb   :  { %v718_v46 = vpop.f32.mrf.mxu2  ;;  %v744_v47 = vpop.f32.mrf.mxu3 }
 0x3bc   :  { %v719_v63 = vadd.f32 %v718_v46, %v158_v19  ;;  %v745_v49 = vadd.f32 %v744_v47, %v159_v21 }
 0x3be   :  { %1648 = vmatmul.msk.f32.gmra.mxu0 %vm168_vm1, %v719_v63 }
 0x3c3   :  { %v770_v14 = vpop.f32.mrf.mxu2  ;;  %v796_v16 = vpop.f32.mrf.mxu3 }
 0x3c4   :  { %v771_v15 = vadd.f32 %v770_v14, %v160_v23  ;;  %v797_v17 = vadd.f32 %v796_v16, %v161_v25  ;;  %v921_v23 = vshrl.u32 %v920_v22, 7  ;;  %v1883_v25 = vmov 0.0   ;;  %v1446_v22 = vld [vmem:[#allocation8 + $0x20] sm:$0xff] }
 0x3c6   :  { %1649 = vmatmul.msk.f32.gmra.mxu0 %vm168_vm1, %v745_v49  ;;  %v1654_v50 = vadd.s32 4294967295, %v921_v23  ;;  %v928_v54 = vadd.s32 1, %v921_v23  ;;  %v1445_v23 = vld [vmem:[#allocation8 + $0x18] sm:$0xff] }
 0x3c8   :  { %vm925_vm9 = vcmp.eq.s32.totalorder %v923_v4, %v1654_v50  ;;  %vm929_vm10 = vcmp.eq.s32.totalorder %v923_v4, %v928_v54 }
 0x3c9   :  { %v1655_v52 = vsel %vm925_vm9, 1.0, %v1883_v25  ;;  %v1656_v55 = vsel %vm929_vm10, 1.0, %v1883_v25 }
 0x3cb   :  { %v822_v18 = vpop.f32.mrf.mxu2 }
 0x3cc   :  { %v823_v19 = vadd.f32 %v822_v18, %v162_v27 }
 0x3ce   :  { %1650 = vmatmul.msk.f32.gmra.mxu0 %vm168_vm1, %v771_v15 }
 0x3d6   :  { %1651 = vmatmul.msk.f32.gmra.mxu0 %vm168_vm1, %v797_v17 }
 0x3de   :  { %1652 = vmatmul.msk.f32.gmra.mxu0 %vm168_vm1, %v823_v19 }
 0x3e1   :  { %v848_v20 = vpop.f32.mrf.mxu3 }
 0x3e2   :  { %v849_v21 = vadd.f32 %v848_v20, %v163_v29 }
 0x3e6   :  { %1653 = vmatmul.msk.f32.gmra.mxu0 %vm168_vm1, %v849_v21 }
 0x41b   :  { %v896_v24 = vpop.f32.mrf.mxu0 }
 0x41c   :  { %954 = vmatpush.msra.mxu2 %v896_v24 }
 0x41d   :  { %1657 = vmatmul.msk.f32.vlgmr.msra.gmra.mxu2 %vm450_vm2, %v1655_v52 }
 0x423   :  { %v899_v26 = vpop.f32.mrf.mxu0 }
 0x424   :  { %1153 = vrot.lane.b32.xlu2 %v899_v26, %s1882_s3  ;;  %978 = vmatpush.msra.mxu3 %v899_v26 }
 0x425   :  { %1658 = vmatmul.msk.f32.vlgmr.msra.gmra.mxu3 %vm450_vm2, %v1655_v52 }
 0x43b   :  { %v902_v27 = vpop.f32.mrf.mxu0 }
 0x43c   :  { %1176 = vrot.lane.b32.xlu1 %v902_v27, %s1882_s3  ;;  %1002 = vmatpush.msrb.mxu1 %v902_v27 }
 0x43d   :  { %1659 = vmatmul.msk.f32.vlgmr.msrb.gmra.mxu1 %vm450_vm2, %v1655_v52 }
 0x443   :  { %v905_v28 = vpop.f32.mrf.mxu0 }
 0x444   :  { %1026 = vmatpush.msrb.mxu2 %v905_v28 }
 0x445   :  { %1660 = vmatmul.msk.f32.vlgmr.msrb.gmra.mxu2 %vm450_vm2, %v1655_v52 }
 0x44b   :  { %v908_v29 = vpop.f32.mrf.mxu0 }
 0x44c   :  { %1222 = vrot.lane.b32.xlu2 %v908_v29, %s1882_s3  ;;  %1050 = vmatpush.msrb.mxu3 %v908_v29 }
 0x44d   :  { %1661 = vmatmul.msk.f32.vlgmr.msrb.gmra.mxu3 %vm450_vm2, %v1655_v52 }
 0x453   :  { %v911_v30 = vpop.f32.mrf.mxu0 }
 0x454   :  { %1245 = vrot.lane.b32.xlu1 %v911_v30, %s1882_s3  ;;  %1074 = vmatpush.msra.mxu1 %v911_v30 }
 0x455   :  { %1662 = vmatmul.msk.f32.vlgmr.msra.gmra.mxu1 %vm450_vm2, %v1655_v52 }
 0x45b   :  { %v914_v42 = vpop.f32.mrf.mxu0 }
 0x45c   :  { %1127 = vrot.lane.b32.xlu1 %v896_v24, %s1882_s3  ;;  %1268 = vrot.lane.b32.xlu2 %v914_v42, %s1882_s3 }
 0x45d   :  { %1098 = vmatpush.msra.mxu2 %v914_v42 }
 0x45e   :  { %1663 = vmatmul.msk.f32.vlgmr.msra.gmra.mxu2 %vm450_vm2, %v1655_v52 }
 0x463   :  { %v917_v53 = vpop.f32.mrf.mxu0 }
 0x464   :  { %1199 = vrot.lane.b32.xlu1 %v905_v28, %s1882_s3  ;;  %960 = vrot.lane.b32.xlu2 %v899_v26, %s1881_s2 }
 0x465   :  { %1291 = vrot.lane.b32.xlu0 %v917_v53, %s1882_s3  ;;  %1122 = vmatpush.msra.mxu3 %v917_v53 }
 0x466   :  { %1664 = vmatmul.msk.f32.vlgmr.msra.gmra.mxu3 %vm450_vm2, %v1655_v52 }
 0x46c   :  { %933 = vrot.lane.b32.xlu1 %v896_v24, %s1881_s2  ;;  %1008 = vrot.lane.b32.xlu2 %v905_v28, %s1881_s2 }
 0x46d   :  { %1056 = vrot.lane.b32.xlu0 %v911_v30, %s1881_s2 }
 0x474   :  { %984 = vrot.lane.b32.xlu1 %v902_v27, %s1881_s2  ;;  %1080 = vrot.lane.b32.xlu2 %v914_v42, %s1881_s2 }
 0x47c   :  { %1032 = vrot.lane.b32.xlu1 %v908_v29, %s1881_s2 }
 0x47e   :  { %v1154_v56 = vpop.permute.xlu2 %1153 }
 0x47f   :  { %1171 = vmatpush.msrb.mxu2 %v1154_v56 }
 0x480   :  { %1666 = vmatmul.msk.f32.vlgmr.msrb.gmra.mxu2 %vm450_vm2, %v1656_v55 }
 0x484   :  { %1104 = vrot.lane.b32.xlu1 %v917_v53, %s1881_s2 }
 0x4a0   :  { %v956_v33 = vpop.f32.mrf.mxu2 }
 0x4a6   :  { %v1223_v34 = vpop.permute.xlu2 %1222 }
 0x4a7   :  { %1240 = vmatpush.msra.mxu2 %v1223_v34 }
 0x4a8   :  { %1669 = vmatmul.msk.f32.vlgmr.msra.gmra.mxu2 %vm450_vm2, %v1656_v55  ;;  %v980_v1 = vpop.f32.mrf.mxu3 }
 0x4ae   :  { %v1177_v59 = vpop.permute.xlu1 %1176 }
 0x4af   :  { %1194 = vmatpush.msrb.mxu3 %v1177_v59 }
 0x4b0   :  { %1667 = vmatmul.msk.f32.vlgmr.msrb.gmra.mxu3 %vm450_vm2, %v1656_v55 }
 0x4b6   :  { %v1269_v32 = vpop.permute.xlu2 %1268 }
 0x4ba   :  { %v1004_v6 = vpop.f32.mrf.mxu1 }
 0x4be   :  { %v961_v8 = vpop.permute.xlu2 %960 }
 0x4bf   :  { %v981_v10 = vadd.f32 %v980_v1, %v961_v8 }
 0x4c6   :  { %v1246_v57 = vpop.permute.xlu1 %1245  ;;  %v1009_v24 = vpop.permute.xlu2 %1008 }
 0x4c7   :  { %1263 = vmatpush.msra.mxu3 %v1246_v57 }
 0x4c8   :  { %1670 = vmatmul.msk.f32.vlgmr.msra.gmra.mxu3 %vm450_vm2, %v1656_v55  ;;  %v1028_v2 = vpop.f32.mrf.mxu2 }
 0x4c9   :  { %1413 = vmatpush.msrb.mxu3 %v1394_v58  ;;  %v1029_v30 = vadd.f32 %v1028_v2, %v1009_v24 }
 0x4ce   :  { %v1128_v62 = vpop.permute.xlu1 %1127  ;;  %v1081_v2 = vpop.permute.xlu2 %1080 }
 0x4cf   :  { %1148 = vmatpush.msrb.mxu1 %v1128_v62 }
 0x4d0   :  { %1665 = vmatmul.msk.f32.vlgmr.msrb.gmra.mxu1 %vm450_vm2, %v1656_v55  ;;  %1673 = vmatmul.msk.f32.vlgmr.msrb.gmra.mxu3 %vm450_vm2, %v79_v60  ;;  %v1052_v3 = vpop.f32.mrf.mxu3 }
 0x4d2   :  { %v1076_v35 = vpop.f32.mrf.mxu1 }
 0x4d6   :  { %v1200_v0 = vpop.permute.xlu1 %1199 }
 0x4d7   :  { %v1292_v9 = vpop.permute.xlu0 %1291  ;;  %1217 = vmatpush.msra.mxu1 %v1200_v0 }
 0x4d8   :  { %1309 = vmatpush.msrb.mxu2 %v1292_v9  ;;  %1668 = vmatmul.msk.f32.vlgmr.msra.gmra.mxu1 %vm450_vm2, %v1656_v55 }
 0x4d9   :  { %1286 = vmatpush.msrb.mxu1 %v1269_v32  ;;  %1672 = vmatmul.msk.f32.vlgmr.msrb.gmra.mxu2 %vm450_vm2, %v1656_v55 }
 0x4da   :  { %1485 = vmatpush.msra.mxu2 %v1446_v22 }
 0x4db   :  { %1438 = vmatpush.msra.mxu1 %v1419_v51 }
 0x4dc   :  { %1486 = vmatpush.msra.mxu2 %v1445_v23 }
 0x4de   :  { %v934_v61 = vpop.permute.xlu1 %933 }
 0x4df   :  { %v1057_v43 = vpop.permute.xlu0 %1056  ;;  %v957_v49 = vadd.f32 %v956_v33, %v934_v61 }
 0x4e0   :  { %1671 = vmatmul.msk.f32.vlgmr.msrb.gmra.mxu1 %vm450_vm2, %v1656_v55  ;;  %v1077_v46 = vadd.f32 %v1076_v35, %v1057_v43 }
 0x4e1   :  { %v2190_v5 = vpop.f32.mrf.mxu2 }
 0x4e6   :  { %v985_v37 = vpop.permute.xlu1 %984 }
 0x4e7   :  { %v1005_v12 = vadd.f32 %v1004_v6, %v985_v37  ;;  %v1101_v6 = vadd.f32 %v2190_v5, %v1081_v2  ;;  %v1516_v2 = vld [vmem:[#allocation8 + $0x30] sm:$0xff] }
 0x4e9   :  { %v1124_v48 = vpop.f32.mrf.mxu3 }
 0x4ee   :  { %v1033_v11 = vpop.permute.xlu1 %1032 }
 0x4ef   :  { %v1053_v38 = vadd.f32 %v1052_v3, %v1033_v11 }
 0x4f6   :  { %v1105_v60 = vpop.permute.xlu1 %1104 }
 0x4f7   :  { %v1125_v61 = vadd.f32 %v1124_v48, %v1105_v60 }
 0x503   :  { %v1173_v7 = vpop.f32.mrf.mxu2 }
 0x504   :  { %v1315_v36 = vadd.f32 %v1173_v7, %v981_v10 }
 0x506   :  { %v1323_v40 = vmax.f32 %v1315_v36, 0.0 }
 0x508   :  { %v1337_v45 = vsel %vm90_vm0, %v1323_v40, 0.0 }
 0x509   :  { %v1338_v14 = vrot.slane %v1337_v45, 4 }
 0x50b   :  { %v1339_v4 = vadd.f32 %v1338_v14, %v1337_v45 }
 0x50d   :  { %v1340_v42 = vrot.slane %v1339_v4, 2 }
 0x50f   :  { %v1341_v62 = vadd.f32 %v1340_v42, %v1339_v4 }
 0x511   :  { %v1342_v7 = vrot.slane %v1341_v62, 1 }
 0x52b   :  { %v1242_v31 = vpop.f32.mrf.mxu2 }
 0x52c   :  { %v1318_v41 = vadd.f32 %v1242_v31, %v1053_v38 }
 0x52e   :  { %v1326_v63 = vmax.f32 %v1318_v41, 0.0  ;;  %v1343_v41 = vadd.f32 %v1342_v7, %v1341_v62 }
 0x530   :  { %v1358_v18 = vsel %vm90_vm0, %v1326_v63, 0.0 }
 0x531   :  { %v1359_v25 = vrot.slane %v1358_v18, 4 }
 0x533   :  { %v1196_v13 = vpop.f32.mrf.mxu3  ;;  %v1360_v54 = vadd.f32 %v1359_v25, %v1358_v18 }
 0x534   :  { %v1316_v39 = vadd.f32 %v1196_v13, %v1005_v12 }
 0x535   :  { %v1361_v9 = vrot.slane %v1360_v54, 2 }
 0x536   :  { %v1324_v44 = vmax.f32 %v1316_v39, 0.0 }
 0x537   :  { %v1362_v10 = vadd.f32 %v1361_v9, %v1360_v54 }
 0x538   :  { %v1344_v15 = vsel %vm90_vm0, %v1324_v44, 0.0 }
 0x539   :  { %v1345_v20 = vrot.slane %v1344_v15, 4  ;;  %v1363_v48 = vrot.slane %v1362_v10, 1 }
 0x53b   :  { %v1346_v26 = vadd.f32 %v1345_v20, %v1344_v15  ;;  %v1364_v18 = vadd.f32 %v1363_v48, %v1362_v10 }
 0x53d   :  { %v1347_v57 = vrot.slane %v1346_v26, 2  ;;  %v1390_v42 = vmul.f32 0.125, %v1364_v18 }
 0x53f   :  { %v1348_v3 = vadd.f32 %v1347_v57, %v1346_v26 }
 0x541   :  { %v1349_v39 = vrot.slane %v1348_v3, 1 }
 0x54b   :  { %v1265_v47 = vpop.f32.mrf.mxu3 }
 0x54c   :  { %v1319_v16 = vadd.f32 %v1265_v47, %v1077_v46 }
 0x54d   :  { %v1150_v17 = vpop.f32.mrf.mxu1 }
 0x54e   :  { %v1314_v19 = vadd.f32 %v1150_v17, %v957_v49  ;;  %v1327_v21 = vmax.f32 %v1319_v16, 0.0  ;;  %v1350_v49 = vadd.f32 %v1349_v39, %v1348_v3  ;;  %v1387_v16 = vmul.f32 0.125, %v1343_v41 }
 0x550   :  { %v1322_v50 = vmax.f32 %v1314_v19, 0.0  ;;  %v1365_v27 = vsel %vm90_vm0, %v1327_v21, 0.0  ;;  %v1388_v4 = vmul.f32 0.125, %v1350_v49 }
 0x551   :  { %v1366_v34 = vrot.slane %v1365_v27, 4 }
 0x552   :  { %v1330_v52 = vsel %vm90_vm0, %v1322_v50, 0.0 }
 0x553   :  { %v1331_v28 = vrot.slane %v1330_v52, 4  ;;  %v2197_v29 = vpop.f32.mrf.mxu3  ;;  %v1367_v33 = vadd.f32 %v1366_v34, %v1365_v27 }
 0x554   :  { %v1418_v53 = vmax.f32 %v2197_v29, 0.0 }
 0x555   :  { %v1332_v55 = vadd.f32 %v1331_v28, %v1330_v52  ;;  %v1219_v56 = vpop.f32.mrf.mxu1  ;;  %v1368_v12 = vrot.slane %v1367_v33, 2 }
 0x556   :  { %v1317_v59 = vadd.f32 %v1219_v56, %v1029_v30  ;;  %1674 = vmatmul.msk.f32.vlgmr.msra.gmra.mxu1 %vm450_vm2, %v1418_v53 }
 0x557   :  { %v1333_v58 = vrot.slane %v1332_v55, 2  ;;  %v1369_v46 = vadd.f32 %v1368_v12, %v1367_v33  ;;  %v1518_v33 = vld [vmem:[#allocation8 + $0x40] sm:$0xff] }
 0x558   :  { %v1325_v0 = vmax.f32 %v1317_v59, 0.0  ;;  %1534 = vmatpush.msrb.mxu1 %v1518_v33 }
 0x559   :  { %v1334_v32 = vadd.f32 %v1333_v58, %v1332_v55  ;;  %v1370_v21 = vrot.slane %v1369_v46, 1 }
 0x55a   :  { %v1351_v1 = vsel %vm90_vm0, %v1325_v0, 0.0  ;;  %v1444_v0 = vld [vmem:[#allocation8 + $0x10] sm:$0xff] }
 0x55b   :  { %v1335_v51 = vrot.slane %v1334_v32, 1  ;;  %v1352_v37 = vrot.slane %v1351_v1, 4  ;;  %v1371_v27 = vadd.f32 %v1370_v21, %v1369_v46  ;;  %1509 = vmatpush.msra.mxu3 %v1444_v0 }
 0x55c   :  { %v1311_v8 = vpop.f32.mrf.mxu2 }
 0x55d   :  { %v1353_v11 = vadd.f32 %v1352_v37, %v1351_v1  ;;  %v1321_v36 = vadd.f32 %v1311_v8, %v1125_v61  ;;  %v1288_v13 = vpop.f32.mrf.mxu1  ;;  %v1336_v31 = vadd.f32 %v1335_v51, %v1334_v32  ;;  %v1391_v34 = vmul.f32 0.125, %v1371_v27  ;;  %v1517_v1 = vld [vmem:[#allocation8 + $0x38] sm:$0xff]  ;;  %v1515_v61 = vld [vmem:[#allocation8 + $0x28] sm:$0xff] }
 0x55e   :  { %v1320_v38 = vadd.f32 %v1288_v13, %v1101_v6  ;;  %1535 = vmatpush.msrb.mxu1 %v1517_v1 }
 0x55f   :  { %v1354_v35 = vrot.slane %v1353_v11, 2  ;;  %v1329_v40 = vmax.f32 %v1321_v36, 0.0  ;;  %v1386_v5 = vmul.f32 0.125, %v1336_v31 }
 0x560   :  { %v1328_v43 = vmax.f32 %v1320_v38, 0.0  ;;  %1536 = vmatpush.msrb.mxu1 %v1516_v2 }
 0x561   :  { %v1355_v44 = vadd.f32 %v1354_v35, %v1353_v11  ;;  %v1379_v45 = vsel %vm90_vm0, %v1329_v40, 0.0  ;;  %v1456_v22 = vsel %vm1455_vm11, %v1387_v16, %v1386_v5 }
 0x562   :  { %v1380_v63 = vrot.slane %v1379_v45, 4  ;;  %v1372_v47 = vsel %vm90_vm0, %v1328_v43, 0.0  ;;  %v1458_v52 = vsel %vm1457_vm12, %v1388_v4, %v1456_v22  ;;  %1537 = vmatpush.msrb.mxu1 %v1515_v61 }
 0x563   :  { %v1356_v14 = vrot.slane %v1355_v44, 1  ;;  %v1373_v15 = vrot.slane %v1372_v47, 4 }
 0x564   :  { %v1381_v17 = vadd.f32 %v1380_v63, %v1379_v45 }
 0x565   :  { %v1357_v19 = vadd.f32 %v1356_v14, %v1355_v44  ;;  %v1374_v20 = vadd.f32 %v1373_v15, %v1372_v47 }
 0x566   :  { %v1382_v23 = vrot.slane %v1381_v17, 2 }
 0x567   :  { %v1389_v50 = vmul.f32 0.125, %v1357_v19  ;;  %v1375_v24 = vrot.slane %v1374_v20, 2 }
 0x568   :  { %v1383_v25 = vadd.f32 %v1382_v23, %v1381_v17 }
 0x569   :  { %v1376_v26 = vadd.f32 %v1375_v24, %v1374_v20  ;;  %v1460_v28 = vsel %vm1459_vm13, %v1389_v50, %v1458_v52 }
 0x56a   :  { %v1384_v30 = vrot.slane %v1383_v25, 1  ;;  %v1462_v56 = vsel %vm1461_vm14, %v1390_v42, %v1460_v28 }
 0x56b   :  { %v1377_v53 = vrot.slane %v1376_v26, 1  ;;  %v1464_v58 = vsel %vm1463_vm15, %v1391_v34, %v1462_v56 }
 0x56c   :  { %v1385_v54 = vadd.f32 %v1384_v30, %v1383_v25 }
 0x56d   :  { %v1378_v55 = vadd.f32 %v1377_v53, %v1376_v26 }
 0x56e   :  { %v1393_v57 = vmul.f32 0.125, %v1385_v54 }
 0x56f   :  { %v1392_v59 = vmul.f32 0.125, %v1378_v55 }
 0x571   :  { %v1466_v60 = vsel %vm1465_vm3, %v1392_v59, %v1464_v58 }
 0x572   :  { %v1468_v62 = vsel %vm1467_vm4, %v1393_v57, %v1466_v60 }
 0x573   :  { %1675 = vmatmul.msk.f32.vlgmr.msra.gmra.mxu2 %vm90_vm0, %v1468_v62  ;;  %vm1548_vm0 = vcmask 80960  }
 0x5d3   :  { %v1440_v9 = vpop.f32.mrf.mxu1 }
 0x5d4   :  { %v1443_v32 = vmax.f32 %v1440_v9, 0.0 }
 0x5d6   :  { %1676 = vmatmul.msk.f32.vlgmr.msra.gmra.mxu3 %vm450_vm2, %v1443_v32  ;;  %vm1559_vm2 = vcmask 15360  }
 0x5f6   :  { %v1488_v3 = vpop.f32.mrf.mxu2 }
 0x659   :  { %v1511_v51 = vpop.f32.mrf.mxu3 }
 0x65a   :  { %v1512_v37 = vadd.f32 %v1511_v51, %v1488_v3 }
 0x65c   :  { %v1514_v6 = vmax.f32 %v1512_v37, 0.0 }
 0x65e   :  { %1677 = vmatmul.msk.f32.vlgmr.msrb.gmra.mxu1 %vm168_vm1, %v1514_v6 }
 0x6db   :  { %v1539_v7 = vpop.f32.mrf.mxu1 }
 0x6dc   :  { %v1549_v8 = vsel %vm1548_vm0, %v1539_v7, -inf }
 0x6dd   :  { %1550 = vmax.xlane.f32.xlu0 %v1549_v8 }
 0x750   :  { %v1551_v10 = vpop.xlane.xlu0 %1550 }
 0x751   :  { %v1552_v11 = vsub.f32 %v1539_v7, %v1551_v10 }
 0x753   :  { %v1553_v36 = vmul.f32 1.442695, %v1552_v11 }
 0x755   :  { %1741 = vpow2.f32 %v1553_v36 }
 0x75b   :  { %v1742_v13 = vpop.eup %1741 }
 0x75c   :  { %1556 = vrot.lane.b32.xlu2 %v1742_v13, %s1884_s11 }
 0x764   :  { %1543 = vrot.lane.b32.xlu2 %v2197_v29, %s1884_s11 }
 0x76c   :  { %1567 = vrot.lane.b32.xlu2 %v1468_v62, %s1885_s12 }
 0x7b6   :  { %v1557_v12 = vpop.permute.xlu2 %1556 }
 0x7b7   :  { %v1560_v31 = vsel %vm1559_vm2, %v1557_v12, 0.0 }
 0x7b8   :  { %1561 = vadd.xlane.f32.xlu1 %v1560_v31 }
 0x7be   :  { %v1544_v38 = vpop.permute.xlu2 %1543 }
 0x7bf   :  { %v1546_v39 = vadd.f32 %v1544_v38, %v1539_v7 }
 0x7c1   :  { %v1547_v35 = vmax.f32 %v1546_v39, 0.0 }
 0x7c3   :  { %1571 = vrot.lane.b32.xlu2 %v1547_v35, %s1886_s13 }
 0x7c6   :  { %v1568_v29 = vpop.permute.xlu2 %1567 }
 0x7c7   :  { %v1579_v46 = vsel %vm1578_vm5, %v1443_v32, %v1568_v29 }
 0x81d   :  { %v1572_v45 = vpop.permute.xlu2 %1571 }
 0x81e   :  { %v1581_v5 = vsel %vm1580_vm6, %v1579_v46, %v1572_v45 }
 0x82b   :  { %v1562_v40 = vpop.xlane.xlu1 %1561 }
 0x82c   :  { %1743 = vlog2.f32 %v1562_v40 }
 0x832   :  { %v1744_v41 = vpop.eup %1743 }
 0x833   :  { %v1564_v43 = vmul.f32 0.6931472, %v1744_v41 }
 0x835   :  { %v1565_v48 = vadd.f32 %v1564_v43, %v1551_v10 }
 0x837   :  { %v1566_v44 = vsub.f32 %v1539_v7, %v1565_v48 }
 0x839   :  { %1575 = vrot.lane.b32.xlu2 %v1566_v44, %s1887_s14 }
 0x893   :  { %v1576_v63 = vpop.permute.xlu2 %1575 }
 0x894   :  { %v1583_v47 = vsel %vm1582_vm7, %v1581_v5, %v1576_v63 }
 0x895   :  { %v1585_v49 = vsel %vm1584_vm8, %v1583_v47, 0.0 }
 0x896   :  { %1586 = vst.msk [vmem:[#allocation10] sm:$0xff] %vm168_vm1, %v1585_v49 }
 0x897   :  { %1597 = dma.vmem_to_hbm [thread:$0]  %s1593_s16, 128, %s1595_s19, [#allocation4]  }
 0x898   :  { %1871 = dma.done.wait [#allocation4], 128  }
 0x899   :  { %1872 = vsyncadd [#allocation4], 4294967168 }
 0x89a   :  { %1602 = vsyncpa [#allocation3], 1 }
 0x89b   :  { %1603 = vsyncpa [#allocation6], 1 }
 0x89c   :  { %1604 = vsyncpa [#allocation9], 1 }
 0x89d   :  { %1605 = vsyncpa [#allocation4], 1 }

</bundles_post_ra>
